<compile_context>
chip_gen: v5e
topology: v5e:2x2
jax: 0.10.0
libtpu: 0.0.40
codegen_flags: <defaults>
</compile_context>

<pallas_src>
import functools

import numpy as np
import jax
import jax.numpy as jnp
from jax import lax
from jax.experimental import pallas as pl
from jax.experimental.pallas import tpu as pltpu


def _round_up(n, m):
    return ((n + m - 1) // m) * m


# --------------------------------------------------------------------------
# Pallas kernel: whole forward for all LEDs in one shot.
# --------------------------------------------------------------------------
def _fpm_kernel(side_ref, zern_ref, spec_ref, dft_ref, out_ref,
                *, hw, zp, led_pad, inv_r4):
    f32 = jnp.float32

    # --- PupilEstimate_CA (computed ONCE, not per LED):
    #     pupil = zern[0] * exp(1j * sum_z zern[z] * tanh(coeff[z]))
    zern = zern_ref[...]                                     # (Zp, HW) f32
    coef = jnp.tanh(side_ref[0:zp, :])                       # (Zp, 1)  f32
    phase = jnp.sum(zern * coef, axis=0, keepdims=True)      # (1, HW)
    ampli = zern[0:1, :]                                     # (1, HW)
    pup_re = ampli * jnp.cos(phase)
    pup_im = ampli * jnp.sin(phase)

    # --- abbr_spectrum = cropped_spec * pupil, all LEDs at once.
    #     spec is lane-interleaved: lanes [0,hw) = Re, [hw,2hw) = Im.
    #     (1/upsample^2 is folded, squared, into the channel weight below.)
    s_re = spec_ref[:, 0:hw]                                 # (LP, HW) f32
    s_im = spec_ref[:, hw:2 * hw]
    a_re = (s_re * pup_re - s_im * pup_im).astype(jnp.bfloat16)
    a_im = (s_re * pup_im + s_im * pup_re).astype(jnp.bfloat16)

    # --- ifft2(ifftshift(.)) for every LED == complex matmul with the
    #     Kronecker matrix (AH (x) AW)^T = Mr + i*Mi.  Using the half matrix
    #     M = [Mr | Mi]:
    #       o_a = a_re @ M = [a_re@Mr | a_re@Mi]
    #       o_b = a_im @ M = [a_im@Mr | a_im@Mi]
    #       o_re = a_re@Mr - a_im@Mi ,  o_im = a_re@Mi + a_im@Mr
    dft = dft_ref[...]                                       # (HW, 2*HW) bf16
    o_a = jnp.dot(a_re, dft, preferred_element_type=f32)     # (LP, 2*HW) f32
    o_b = jnp.dot(a_im, dft, preferred_element_type=f32)     # (LP, 2*HW) f32
    o_re = o_a[:, 0:hw] - o_b[:, hw:2 * hw]
    o_im = o_a[:, hw:2 * hw] + o_b[:, 0:hw]

    # --- est_intens = |object_LR|^2 ; ChannelAttention weight (tanh) and the
    #     folded 1/upsample_ratio^4 factor applied per LED row.
    intens = o_re * o_re + o_im * o_im                       # (LP, HW)
    w = jnp.tanh(side_ref[zp:zp + led_pad, :]) * inv_r4      # (LP, 1)
    out_ref[...] = intens * w


def fpm_forward_pallas(spec_re, spec_im, zern_flat, phase_coeff, dft_half,
                       channel_w, upsample_ratio, hei, wid):
    led_num, hw = spec_re.shape
    z = zern_flat.shape[0]
    zp = _round_up(z, 8)                       # pad Zernike modes to sublane tile
    led_pad = _round_up(max(led_num, 8), 8)    # pad LED rows -> full sublane tiles
    inv_r4 = 1.0 / float(upsample_ratio) ** 4

    # --- pack / pad inputs for lane- and sublane-aligned kernel tiles -----
    spec = jnp.zeros((led_pad, 2 * hw), jnp.float32)
    spec = spec.at[:led_num, :hw].set(spec_re)
    spec = spec.at[:led_num, hw:].set(spec_im)

    zern = jnp.zeros((zp, hw), jnp.float32).at[:z, :].set(zern_flat)

    # Single side input: rows [0, zp) = raw phase coeffs, rows [zp, zp+LP) =
    # raw channel weights (pad rows are 0 -> tanh(0)=0, harmless).
    side = jnp.zeros((zp + led_pad, 1), jnp.float32)
    side = side.at[:z, 0].set(phase_coeff.reshape(z))
    side = side.at[zp:zp + led_num, 0].set(channel_w.reshape(led_num))

    kernel = functools.partial(_fpm_kernel, hw=hw, zp=zp,
                               led_pad=led_pad, inv_r4=inv_r4)

    # Advisory cost estimate (two (LP, HW) @ (HW, 2HW) matmuls dominate).
    flops = 2 * 2 * led_pad * hw * (2 * hw) + 2 * zp * hw
    transcendentals = 2 * hw + zp + led_pad
    bytes_accessed = (int(spec.size) + int(zern.size) + int(side.size)) * 4 \
        + int(dft_half.size) * 2 + led_pad * hw * 4

    vmem = lambda: pl.BlockSpec(memory_space=pltpu.MemorySpace.VMEM)
    out_flat = pl.pallas_call(
        kernel,
        out_shape=jax.ShapeDtypeStruct((led_pad, hw), jnp.float32),
        in_specs=[vmem(), vmem(), vmem(), vmem()],
        out_specs=vmem(),
        cost_estimate=pl.CostEstimate(flops=flops,
                                      transcendentals=transcendentals,
                                      bytes_accessed=bytes_accessed),
    )(side, zern, spec, dft_half)
    return out_flat[:led_num].reshape(led_num, hei, wid)


# --------------------------------------------------------------------------
# Glue: half Kronecker inverse-DFT matrix with ifftshift folded in.
#   ifft2(ifftshift(S)) = AH @ S @ AW^T,  AN[m,u] = exp(2j*pi*m*(u-N//2)/N)/N
#   => O_flat = S_flat @ (AH (x) AW)^T ; ship only [Re | Im] of that matrix.
# --------------------------------------------------------------------------
def _idft_shift_matrix(n):
    m = np.arange(n, dtype=np.float64).reshape(n, 1)
    u = np.arange(n, dtype=np.float64).reshape(1, n)
    return np.exp(2j * np.pi * m * (u - n // 2) / n) / n


def build_ifft2_half_matrix(hei, wid):
    # Low-res sizes are Hei//upsample, Wid//upsample; keep them even so the
    # folded-shift construction stays on the well-tested path.
    assert hei % 2 == 0 and wid % 2 == 0, "expect even low-res sizes"
    mt = np.kron(_idft_shift_matrix(hei), _idft_shift_matrix(wid)).T
    return np.concatenate([mt.real, mt.imag], axis=1).astype(np.float32)


if __name__ == "__main__":
    # ---- args (small shapes consistent with the module) ----
    pixel_size = 6.5
    magnification = 4.0
    NA_obj = 0.1
    wavelength = 0.632
    LED_spacing = 4000.0
    illumination_distance = 90000.0
    LED_num_side = 3
    upsample_ratio = 2
    Hei, Wid = 32, 32
    Z = 15                                    # number of Zernike modes

    # ---- geometry exactly as in FPM_estimator_zheng.__init__ ----
    uniform_px = pixel_size / magnification
    LED_num_center = (LED_num_side - 1) / 2
    lx = (np.arange(LED_num_side, dtype=np.float32) - LED_num_center) * LED_spacing
    ly = (np.arange(LED_num_side, dtype=np.float32) - LED_num_center) * LED_spacing
    LED_x, LED_y = np.meshgrid(lx, ly)
    LED_num = LED_num_side * LED_num_side
    LED_x = LED_x.reshape((LED_num, 1)) + 130
    LED_y = LED_y.reshape((LED_num, 1)) + 300
    distances = np.sqrt(np.square(LED_x) + np.square(LED_y)
                        + np.square(illumination_distance))
    kiy = (LED_y / distances) / wavelength
    kix = (LED_x / distances) / wavelength
    hei = Hei // upsample_ratio
    wid = Wid // upsample_ratio
    deltaFy = 1.0 / (hei * uniform_px)
    deltaFx = 1.0 / (wid * uniform_px)
    deltaF = np.min([deltaFx, deltaFy])
    pupil_radius = np.round(NA_obj / wavelength / deltaF)
    yv = np.arange(-np.fix(wid / 2), np.ceil(wid / 2))
    xv = np.arange(-np.fix(hei / 2), np.ceil(hei / 2))
    xg, yg = np.meshgrid(xv, yv)
    radius = np.sqrt(xg * xg + yg * yg)
    pupil = np.single(radius <= pupil_radius)            # (hei, wid)
    shift_fy = kiy / deltaF
    shift_fx = kix / deltaF
    center_y = np.ceil((Hei - 1) / 2)
    center_x = np.ceil((Wid - 1) / 2)
    LED_fy = shift_fy + center_y
    LED_fx = shift_fx + center_x
    tops = np.round(LED_fy[:, 0] - np.fix(hei / 2)).astype(np.int32)
    lefts = np.round(LED_fx[:, 0] - np.fix(wid / 2)).astype(np.int32)

    # ---- deterministic synthetic parameters / inputs ----
    key = jax.random.PRNGKey(0)
    k_int, k_zern, k_pc, k_cw = jax.random.split(key, 4)

    # zernike_pupils: mode 0 = flat circular pupil, higher modes = small
    # smooth random patterns masked by the pupil.
    zern_hi = 0.1 * jax.random.normal(k_zern, (Z - 1, hei, wid), jnp.float32)
    zernike_pupils = jnp.concatenate(
        [jnp.asarray(pupil)[None], zern_hi * jnp.asarray(pupil)[None]], axis=0)

    # Trainable parameters (small nonzero values so the pupil-phase and
    # channel-attention paths are exercised numerically).
    phase_coeff = 0.2 * jax.random.normal(k_pc, (Z, 1, 1), jnp.float32)
    channel_weights_raw = (1.0 + 0.1 * jax.random.normal(
        k_cw, (LED_num, 1, 1), jnp.float32))

    # est_field init: center-LED intensity bilinearly upsampled, zero phase.
    imaged_intens = jax.random.uniform(k_int, (LED_num, hei, wid), jnp.float32)
    center = imaged_intens[(LED_num - 1) // 2]
    est_field = jax.image.resize(center, (Hei, Wid),
                                 method="bilinear").astype(jnp.complex64)

    # ---- glue: forward fft2 + fftshift of full-res field, per-LED crop ----
    gtr_spec = jnp.fft.fftshift(jnp.fft.fft2(est_field))
    selected = jax.vmap(
        lambda t, l: lax.dynamic_slice(gtr_spec, (t, l), (hei, wid))
    )(jnp.asarray(tops), jnp.asarray(lefts))             # (LED_num, hei, wid) c64

    spec_re = jnp.real(selected).reshape(LED_num, hei * wid).astype(jnp.float32)
    spec_im = jnp.imag(selected).reshape(LED_num, hei * wid).astype(jnp.float32)
    zern_flat = zernike_pupils.reshape(Z, hei * wid)

    # ---- half Kronecker inverse-DFT matrix [Mr | Mi] (bf16 MXU operand) ----
    dft_half = jnp.asarray(build_ifft2_half_matrix(hei, wid),
                           dtype=jnp.bfloat16)           # (HW, 2*HW)

    # ---- run the Pallas kernel ----
    est_intens = fpm_forward_pallas(
        spec_re, spec_im, zern_flat, phase_coeff.reshape(Z, 1), dft_half,
        channel_weights_raw.reshape(LED_num, 1), upsample_ratio, hei, wid)
    est_intens = jax.block_until_ready(est_intens)

    # ---- pure-JAX reference (mirrors the PyTorch forward) ----
    pupil_phase = jnp.sum(zernike_pupils * jnp.tanh(phase_coeff), axis=0)
    pupil_cplx = zernike_pupils[0] * jnp.exp(1j * pupil_phase)
    abbr = selected * pupil_cplx / (upsample_ratio ** 2)
    obj_lr = jnp.fft.ifft2(jnp.fft.ifftshift(abbr, axes=(1, 2)))
    ref = jnp.square(jnp.abs(obj_lr)) * jnp.tanh(channel_weights_raw)
    ref = jax.block_until_ready(ref)

    rel_err = float(jnp.max(jnp.abs(est_intens - ref)) /
                    (jnp.max(jnp.abs(ref)) + 1e-12))
    assert est_intens.shape == (LED_num, hei, wid)
    assert rel_err < 5e-2, f"relative error too large: {rel_err}"

    # TODO(synk): 'simulator' mode and the 'cos4' calibration branch need
    # external data (pupil_real / cos4_weights.mat) and are not implemented.
    print("KERNEL_OK")
</pallas_src>

<mosaic_0001>
module attributes {stable_mosaic.version = 11 : i64} {
  func.func @_fpm_kernel(%arg0: memref<32x1xf32, #tpu.memory_space<vmem>>, %arg1: memref<16x256xf32, #tpu.memory_space<vmem>>, %arg2: memref<16x512xf32, #tpu.memory_space<vmem>>, %arg3: memref<256x512xbf16, #tpu.memory_space<vmem>>, %arg4: memref<16x256xf32, #tpu.memory_space<vmem>>) attributes {dimension_semantics = [], scalar_prefetch = 0 : i64, scratch_operands = 0 : i64, tpu.core_type = #tpu.core_type<tc>} {
    %c0 = arith.constant 0 : index
    %c0_0 = arith.constant 0 : index
    %0 = vector.load %arg1[%c0, %c0_0] : memref<16x256xf32, #tpu.memory_space<vmem>>, vector<16x256xf32>
    %c0_1 = arith.constant 0 : index
    %c0_2 = arith.constant 0 : index
    %1 = vector.load %arg0[%c0_1, %c0_2] : memref<32x1xf32, #tpu.memory_space<vmem>>, vector<16x1xf32>
    %2 = math.tanh %1 : vector<16x1xf32>
    %3 = vector.broadcast %2 : vector<16x1xf32> to vector<16x256xf32>
    %4 = arith.mulf %0, %3 : vector<16x256xf32>
    %cst = arith.constant dense<0.000000e+00> : vector<256xf32>
    %5 = vector.multi_reduction <add>, %4, %cst [0] : vector<16x256xf32> to vector<256xf32>
    %6 = vector.shape_cast %5 : vector<256xf32> to vector<1x256xf32>
    %7 = vector.extract_strided_slice %0 {offsets = [0, 0], sizes = [1, 256], strides = [1, 1]} : vector<16x256xf32> to vector<1x256xf32>
    %8 = math.cos %6 : vector<1x256xf32>
    %9 = arith.mulf %7, %8 : vector<1x256xf32>
    %10 = math.sin %6 : vector<1x256xf32>
    %11 = arith.mulf %7, %10 : vector<1x256xf32>
    %c0_3 = arith.constant 0 : index
    %c0_4 = arith.constant 0 : index
    %12 = vector.load %arg2[%c0_3, %c0_4] : memref<16x512xf32, #tpu.memory_space<vmem>>, vector<16x256xf32>
    %c0_5 = arith.constant 0 : index
    %c256 = arith.constant 256 : index
    %13 = vector.load %arg2[%c0_5, %c256] : memref<16x512xf32, #tpu.memory_space<vmem>>, vector<16x256xf32>
    %14 = vector.broadcast %9 : vector<1x256xf32> to vector<16x256xf32>
    %15 = arith.mulf %12, %14 : vector<16x256xf32>
    %16 = vector.broadcast %11 : vector<1x256xf32> to vector<16x256xf32>
    %17 = arith.mulf %13, %16 : vector<16x256xf32>
    %18 = arith.subf %15, %17 : vector<16x256xf32>
    %19 = arith.truncf %18 : vector<16x256xf32> to vector<16x256xbf16>
    %20 = vector.broadcast %11 : vector<1x256xf32> to vector<16x256xf32>
    %21 = arith.mulf %12, %20 : vector<16x256xf32>
    %22 = vector.broadcast %9 : vector<1x256xf32> to vector<16x256xf32>
    %23 = arith.mulf %13, %22 : vector<16x256xf32>
    %24 = arith.addf %21, %23 : vector<16x256xf32>
    %25 = arith.truncf %24 : vector<16x256xf32> to vector<16x256xbf16>
    %c0_6 = arith.constant 0 : index
    %c0_7 = arith.constant 0 : index
    %26 = vector.load %arg3[%c0_6, %c0_7] : memref<256x512xbf16, #tpu.memory_space<vmem>>, vector<256x512xbf16>
    %cst_8 = arith.constant dense<0.000000e+00> : vector<16x512xf32>
    %27 = tpu.matmul %19, %26, %cst_8 {dimension_numbers = #tpu.dot_dimension_numbers<[1], [0], [0], [1], [0, 0, 1, 1], [], []>} : vector<16x256xbf16>, vector<256x512xbf16>, vector<16x512xf32> -> vector<16x512xf32>
    %cst_9 = arith.constant dense<0.000000e+00> : vector<16x512xf32>
    %28 = tpu.matmul %25, %26, %cst_9 {dimension_numbers = #tpu.dot_dimension_numbers<[1], [0], [0], [1], [0, 0, 1, 1], [], []>} : vector<16x256xbf16>, vector<256x512xbf16>, vector<16x512xf32> -> vector<16x512xf32>
    %29 = vector.extract_strided_slice %27 {offsets = [0, 0], sizes = [16, 256], strides = [1, 1]} : vector<16x512xf32> to vector<16x256xf32>
    %30 = vector.extract_strided_slice %28 {offsets = [0, 256], sizes = [16, 256], strides = [1, 1]} : vector<16x512xf32> to vector<16x256xf32>
    %31 = arith.subf %29, %30 : vector<16x256xf32>
    %32 = vector.extract_strided_slice %27 {offsets = [0, 256], sizes = [16, 256], strides = [1, 1]} : vector<16x512xf32> to vector<16x256xf32>
    %33 = vector.extract_strided_slice %28 {offsets = [0, 0], sizes = [16, 256], strides = [1, 1]} : vector<16x512xf32> to vector<16x256xf32>
    %34 = arith.addf %32, %33 : vector<16x256xf32>
    %35 = arith.mulf %31, %31 : vector<16x256xf32>
    %36 = arith.mulf %34, %34 : vector<16x256xf32>
    %37 = arith.addf %35, %36 : vector<16x256xf32>
    %c16 = arith.constant 16 : index
    %c0_10 = arith.constant 0 : index
    %38 = vector.load %arg0[%c16, %c0_10] : memref<32x1xf32, #tpu.memory_space<vmem>>, vector<16x1xf32>
    %39 = math.tanh %38 : vector<16x1xf32>
    %cst_11 = arith.constant 6.250000e-02 : f32
    %40 = vector.broadcast %cst_11 : f32 to vector<16x1xf32>
    %41 = arith.mulf %39, %40 : vector<16x1xf32>
    %42 = vector.broadcast %41 : vector<16x1xf32> to vector<16x256xf32>
    %43 = arith.mulf %37, %42 : vector<16x256xf32>
    %c0_12 = arith.constant 0 : index
    %c0_13 = arith.constant 0 : index
    %44 = vector.load %arg4[%c0_12, %c0_13] : memref<16x256xf32, #tpu.memory_space<vmem>>, vector<16x256xf32>
    tpu.vector_store %arg4[%c0_12, %c0_13], %43 {strides = array<i32>} : memref<16x256xf32, #tpu.memory_space<vmem>>, vector<16x256xf32>,
    return
  }
}

</mosaic_0001>

<bundles_post_ra>
// kernel: tpu_custom_call.1
= control target key start
LH: loop header
LB: loop body
LE: loop exit
PB: predicated region body
PF: predicated region fallthrough
CT: control target
= control target key end

     0   :  { %9 = vsyncpa [#allocation3], 0  ;;  %s2487_s0 = inlined_call_operand.vmem [shape: f32[32,1], index: 0, kind: input, shape index: {}]   ;;  %s2488_s1 = inlined_call_operand.vmem [shape: f32[16,256], index: 1, kind: input, shape index: {}]   ;;  %s2489_s2 = inlined_call_operand.hbm [shape: f32[16,512], index: 2, kind: input, shape index: {}]   ;;  %s2490_s3 = inlined_call_operand.hbm [shape: bf16[256,512], index: 3, kind: input, shape index: {}]   ;;  %s2491_s4 = inlined_call_operand.hbm [shape: f32[16,256], index: 4, kind: output, shape index: {}]  }
   0x1   :  { %10 = vsyncpa [#allocation6], 0 }
   0x2   :  { %11 = vsyncpa [#allocation4], 0  ;;  %s20_s17 = sshll.u32 %s2489_s2, 4  ;;  %s1856_s18 = smov [#allocation2]   ;;  %s21_s17 = int_to_ptr.hbm [resolvable:$true] %s20_s17 }
   0x3   :  { %s22_s19 = sshll.u32 %s1856_s18, 4  ;;  %s33_s22 = sshll.u32 %s2490_s3, 4  ;;  %s23_s19 = int_to_ptr.vmem [resolvable:$true] %s22_s19  ;;  %s34_s22 = int_to_ptr.hbm [resolvable:$true] %s33_s22 }
   0x4   :  { %s1857_s23 = smov 512   ;;  %s1858_s24 = smov 32  }
   0x5   :  { %28 = dma.hbm_to_vmem [thread:$0]  %s21_s17, 1024, %s23_s19, [#allocation3], %s1857_s23, %s1857_s23, %s1858_s24  }
   0x6   :  { %s1859_s25 = smov [#allocation5]   ;;  %s1860_s27 = smov 256  }
   0x7   :  { %s35_s26 = sshll.u32 %s1859_s25, 4  ;;  %s1861_s28 = smov 16   ;;  %s36_s26 = int_to_ptr.vmem [resolvable:$true] %s35_s26 }
   0x8   :  { %41 = dma.hbm_to_vmem [thread:$0]  %s34_s22, 8192, %s36_s26, [#allocation6], %s1860_s27, %s1860_s27, %s1861_s28  }
   0x9   :  { %1850 = dma.done.wait [#allocation3], 1024  }
   0xa   :  { %1851 = vsyncadd [#allocation3], 4294966272 }
   0xb   :  { %1852 = dma.done.wait [#allocation6], 8192  }
   0xc   :  { %1853 = vsyncadd [#allocation6], 4294959104  ;;  %v1862_v0 = vmov 0   ;;  %v54_v1 = vld [vmem:[%s2487_s0] sm:$0xff]  ;;  %v55_v2 = vld [vmem:[%s2487_s0 + $0x8] sm:$0xff]  ;;  %s1406_s23 = sshll.u32 %s2491_s4, 4  ;;  %s1407_s23 = int_to_ptr.hbm [resolvable:$true] %s1406_s23 }
   0xd   :  { %1766 = vset.pattern.permute.xlu0 %v1862_v0  ;;  %1767 = vset.pattern.permute.xlu1 %v1862_v0  ;;  %1768 = vtanh.f32 %v54_v1  ;;  %v50_v6 = vld [vmem:[%s2488_s1] sm:$0xff]  ;;  %v51_v7 = vld [vmem:[%s2488_s1 + $0x8] sm:$0xff]  ;;  %v52_v8 = vld [vmem:[%s2488_s1 + $0x10] sm:$0xff]  ;;  %v1863_v52 = vmov 683565275  }
   0xe   :  { %1770 = vtanh.f32 %v55_v2  ;;  %v53_v9 = vld [vmem:[%s2488_s1 + $0x18] sm:$0xff]  ;;  %v1864_v54 = vmov 2475754826   ;;  %v1865_v58 = vmov 2131351028  }
   0xf   :  { %v1866_v61 = vmov 2102212464   ;;  %v1867_v1 = vmov 920167782  }
  0x13   :  { %v1769_v3 = vpop.eup %1768 }
  0x14   :  { %60 = vperm.xlu0 %1766, %v1769_v3   ;;  %v1771_v4 = vpop.eup %1770 }
  0x1c   :  { %65 = vperm.xlu0 %1766, %v1771_v4   ;;  %v1868_v4 = vmov 1326507024  }
  0x86   :  { %v61_v5 = vpop.permute.xlu0 %60 }
  0x87   :  { %v68_v11 = vmul.f32 %v61_v5, %v50_v6  ;;  %v69_v12 = vmul.f32 %v61_v5, %v51_v7 }
  0x8e   :  { %v66_v10 = vpop.permute.xlu0 %65 }
  0x8f   :  { %v70_v13 = vmul.f32 %v66_v10, %v52_v8  ;;  %v71_v14 = vmul.f32 %v66_v10, %v53_v9 }
  0x91   :  { %v72_v15 = vadd.f32 %v70_v13, %v68_v11  ;;  %v79_v16 = vadd.f32 %v71_v14, %v69_v12 }
  0x93   :  { %v73_v17 = vrot.slane %v72_v15, 4  ;;  %v80_v18 = vrot.slane %v79_v16, 4 }
  0x95   :  { %v74_v19 = vadd.f32 %v73_v17, %v72_v15  ;;  %v81_v20 = vadd.f32 %v80_v18, %v79_v16 }
  0x97   :  { %v75_v21 = vrot.slane %v74_v19, 2  ;;  %v82_v22 = vrot.slane %v81_v20, 2 }
  0x99   :  { %v76_v23 = vadd.f32 %v75_v21, %v74_v19  ;;  %v83_v24 = vadd.f32 %v82_v22, %v81_v20 }
  0x9b   :  { %v77_v25 = vrot.slane %v76_v23, 1  ;;  %v84_v26 = vrot.slane %v83_v24, 1 }
  0x9d   :  { %v1924_v27 = vadd.f32 %v77_v25, %v76_v23  ;;  %v1926_v28 = vadd.f32 %v84_v26, %v83_v24 }
  0x9f   :  { %v86_v29 = vand.u32 2147483647, %v1924_v27  ;;  %v89_v30 = vand.u32 2139095040, %v1924_v27  ;;  %v2492_v31 = vand.u32 2147483647, %v1926_v28  ;;  %v243_v32 = vand.u32 2139095040, %v1926_v28 }
  0xa1   :  { %v90_v33 = vshrl.u32 %v89_v30, 23  ;;  %v93_v34 = vand.u32 8388607, %v86_v29  ;;  %v244_v35 = vshrl.u32 %v243_v32, 23  ;;  %v247_v38 = vand.u32 8388607, %v2492_v31 }
  0xa3   :  { %v1420_v36 = vadd.s32 4294967169, %v90_v33  ;;  %v94_v37 = vor.u32 8388608, %v93_v34  ;;  %v1423_v39 = vadd.s32 4294967169, %v244_v35  ;;  %v248_v43 = vor.u32 8388608, %v247_v38 }
  0xa5   :  { %v96_v40 = vadd.s32 1, %v1420_v36  ;;  %v250_v41 = vadd.s32 1, %v1423_v39  ;;  %v1936_v42 = vshll.u32 %v94_v37, 8  ;;  %v1943_v50 = vshll.u32 %v248_v43, 8 }
  0xa7   :  { %vm97_vm0 = vcmp.gt.s32.totalorder %v96_v40, 0  ;;  %vm251_vm1 = vcmp.gt.s32.totalorder %v250_v41, 0  ;;  %v1939_v48 = vand.u32 65535, %v1936_v42  ;;  %v136_v56 = vshrl.u32 %v1936_v42, 16 }
  0xa8   :  { %v98_v44 = vsel %vm97_vm0, %v96_v40, 0  ;;  %v252_v46 = vsel %vm251_vm1, %v250_v41, 0 }
  0xa9   :  { %v100_v45 = vand.u32 31, %v98_v44  ;;  %v1941_v49 = vand.u32 31, %v252_v46  ;;  %v1945_v51 = vshrl.u32 %v98_v44, 5  ;;  %v1983_v36 = vshrl.u32 %v252_v46, 5 }
  0xab   :  { %v101_v47 = vsub.s32 32, %v100_v45  ;;  %v103_v53 = vshll.u32 %v1863_v52, %v100_v45  ;;  %v106_v55 = vshll.u32 %v1864_v54, %v100_v45  ;;  %v109_v60 = vshll.u32 %v1865_v58, %v100_v45 }
  0xac   :  { %v112_v63 = vshll.u32 %v1866_v61, %v100_v45  ;;  %v115_v3 = vshll.u32 %v1867_v1, %v100_v45  ;;  %v1955_v9 = vsub.s32 32, %v1941_v49  ;;  %vm118_vm2 = vcmp.lt.s32.totalorder %v1945_v51, 1 }
  0xad   :  { %v104_v57 = vshrl.u32 %v1864_v54, %v101_v47  ;;  %v107_v59 = vshrl.u32 %v1865_v58, %v101_v47  ;;  %v110_v62 = vshrl.u32 %v1866_v61, %v101_v47  ;;  %v113_v2 = vshrl.u32 %v1867_v1, %v101_v47 }
  0xae   :  { %v116_v5 = vshrl.u32 %v1868_v4, %v101_v47  ;;  %vm119_vm3 = vcmp.lt.s32.totalorder %v1945_v51, 2  ;;  %v102_v12 = vshrl.u32 %v1863_v52, %v101_v47  ;;  %vm121_vm4 = vcmp.lt.s32.totalorder %v1945_v51, 4 }
  0xaf   :  { %v105_v6 = vor.u32 %v104_v57, %v103_v53  ;;  %v108_v7 = vor.u32 %v107_v59, %v106_v55  ;;  %v111_v8 = vor.u32 %v110_v62, %v109_v60  ;;  %v114_v10 = vor.u32 %v113_v2, %v112_v63 }
  0xb0   :  { %v117_v11 = vor.u32 %v116_v5, %v115_v3  ;;  %vm120_vm5 = vcmp.lt.s32.totalorder %v1945_v51, 3  ;;  %v257_v17 = vshll.u32 %v1863_v52, %v1941_v49  ;;  %v258_v21 = vshrl.u32 %v1864_v54, %v1955_v9 }
  0xb1   :  { %v126_v13 = vsel %vm118_vm2, %v105_v6, %v108_v7  ;;  %v130_v14 = vsel %vm118_vm2, %v108_v7, %v111_v8  ;;  %v127_v15 = vsel %vm121_vm4, %v114_v10, 920167782  ;;  %v123_v18 = vsel %vm121_vm4, %v111_v8, 2102212464 }
  0xb2   :  { %v131_v16 = vsel %vm121_vm4, %v117_v11, 1326507024  ;;  %v128_v19 = vsel %vm120_vm5, %v111_v8, %v127_v15  ;;  %v260_v24 = vshll.u32 %v1864_v54, %v1941_v49  ;;  %v261_v25 = vshrl.u32 %v1865_v58, %v1955_v9 }
  0xb3   :  { %v132_v20 = vsel %vm120_vm5, %v114_v10, %v131_v16  ;;  %v129_v22 = vsel %vm119_vm3, %v126_v13, %v128_v19  ;;  %v122_v34 = vsel %vm118_vm2, %v102_v12, %v105_v6  ;;  %v124_v35 = vsel %vm120_vm5, %v108_v7, %v123_v18 }
  0xb4   :  { %v133_v23 = vsel %vm119_vm3, %v130_v14, %v132_v20  ;;  %v159_v32 = vand.u32 65535, %v129_v22  ;;  %v160_v33 = vshrl.u32 %v129_v22, 16  ;;  %v1985_v37 = vor.u32 %v258_v21, %v257_v17 }
  0xb5   :  { %v137_v26 = vand.u32 65535, %v133_v23  ;;  %v138_v30 = vshrl.u32 %v133_v23, 16  ;;  %v1988_v40 = vor.u32 %v261_v25, %v260_v24  ;;  %v264_v41 = vshrl.u32 %v1866_v61, %v1955_v9 }
  0xb6   :  { %v162_v44 = vmul.u32 %v160_v33, %v1939_v48  ;;  %v163_v45 = vmul.u32 %v159_v32, %v136_v56  ;;  %v263_v47 = vshll.u32 %v1865_v58, %v1941_v49  ;;  %v161_v54 = vmul.u32 %v159_v32, %v1939_v48 }
  0xb7   :  { %v140_v38 = vmul.u32 %v138_v30, %v1939_v48  ;;  %v141_v39 = vmul.u32 %v137_v26, %v136_v56  ;;  %v139_v43 = vmul.u32 %v137_v26, %v1939_v48  ;;  %v142_v53 = vmul.u32 %v138_v30, %v136_v56 }
  0xb8   :  { %v164_v55 = vmul.u32 %v160_v33, %v136_v56  ;;  %v165_v62 = vshll.u32 %v162_v44, 16  ;;  %v167_v2 = vshll.u32 %v163_v45, 16  ;;  %v265_v3 = vor.u32 %v264_v41, %v263_v47  ;;  %v1718_v41 = vld [vmem:[#allocation5 + $0xec] sm:$0xf0] }
  0xb9   :  { %v143_v46 = vshll.u32 %v140_v38, 16  ;;  %v144_v57 = vshrl.u32 %v140_v38, 16  ;;  %v145_v59 = vshll.u32 %v141_v39, 16  ;;  %v146_v60 = vshrl.u32 %v141_v39, 16  ;;  %v1546_v39 = vld [vmem:[#allocation5 + $0xe0] sm:$0xf] }
  0xba   :  { %vm169_vm7 = vc.u32 %v161_v54, %v165_v62  ;;  %v171_v6 = vadd.s32 %v165_v62, %v161_v54  ;;  %v267_v58 = vshrl.u32 %v1867_v1, %v1955_v9  ;;  %v266_v56 = vshll.u32 %v1866_v61, %v1941_v49 }
  0xbb   :  { %vm147_vm6 = vc.u32 %v139_v43, %v143_v46  ;;  %v149_v63 = vadd.s32 %v143_v46, %v139_v43  ;;  %v170_v48 = vsel %vm169_vm7, 1, %v1862_v0  ;;  %v269_v11 = vshll.u32 %v1867_v1, %v1941_v49 }
  0xbc   :  { %v148_v5 = vsel %vm147_vm6, 1, %v1862_v0  ;;  %v172_v10 = vadd.s32 %v170_v48, %v164_v55  ;;  %vm173_vm9 = vc.u32 %v171_v6, %v167_v2  ;;  %v268_v14 = vor.u32 %v267_v58, %v266_v56  ;;  %v1750_v48 = vld [vmem:[#allocation5 + $0x1ec] sm:$0xf0] }
  0xbd   :  { %v150_v7 = vadd.s32 %v148_v5, %v142_v53  ;;  %vm151_vm8 = vc.u32 %v149_v63, %v145_v59  ;;  %v174_v13 = vsel %vm173_vm9, 1, %v1862_v0  ;;  %v270_v15 = vshrl.u32 %v1868_v4, %v1955_v9 }
  0xbe   :  { %v152_v8 = vsel %vm151_vm8, 1, %v1862_v0  ;;  %v166_v16 = vshrl.u32 %v162_v44, 16  ;;  %v168_v17 = vshrl.u32 %v163_v45, 16  ;;  %v2008_v18 = vadd.s32 %v171_v6, %v167_v2 }
  0xbf   :  { %v154_v12 = vadd.s32 %v152_v8, %v150_v7  ;;  %v176_v19 = vadd.s32 %v174_v13, %v172_v10  ;;  %v271_v20 = vor.u32 %v270_v15, %v269_v11  ;;  %vm272_vm10 = vcmp.lt.s32.totalorder %v1983_v36, 1  ;;  %v1548_v11 = vld [vmem:[#allocation5 + $0xf0] sm:$0xf0]  ;;  %v1748_v15 = vld [vmem:[#allocation5 + $0x1e4] sm:$0xf] }
  0xc0   :  { %vm275_vm11 = vcmp.lt.s32.totalorder %v1983_v36, 4  ;;  %vm274_vm12 = vcmp.lt.s32.totalorder %v1983_v36, 3  ;;  %v280_v49 = vsel %vm272_vm10, %v1985_v37, %v1988_v40  ;;  %vm273_vm13 = vcmp.lt.s32.totalorder %v1983_v36, 2 }
  0xc1   :  { %v155_v61 = vadd.s32 %v154_v12, %v144_v57  ;;  %v177_v21 = vadd.s32 %v176_v19, %v166_v16  ;;  %v281_v1 = vsel %vm275_vm11, %v268_v14, 920167782  ;;  %v284_v23 = vsel %vm272_vm10, %v1988_v40, %v265_v3  ;;  %v1676_v16 = vld [vmem:[#allocation5 + $0x1f0] sm:$0xf0]  ;;  %v1714_v19 = vld [vmem:[#allocation5 + $0xcc] sm:$0xf0] }
  0xc2   :  { %v282_v22 = vsel %vm274_vm12, %v265_v3, %v281_v1  ;;  %v125_v24 = vsel %vm119_vm3, %v122_v34, %v124_v35  ;;  %v285_v30 = vsel %vm275_vm11, %v271_v20, 1326507024  ;;  %v289_v33 = vand.u32 65535, %v1943_v50  ;;  %v1746_v1 = vld [vmem:[#allocation5 + $0x1cc] sm:$0xf0] }
  0xc3   :  { %v2019_v4 = vadd.s32 %v155_v61, %v146_v60  ;;  %v178_v25 = vadd.s32 %v177_v21, %v168_v17  ;;  %v283_v26 = vsel %vm273_vm13, %v280_v49, %v282_v22  ;;  %v286_v32 = vsel %vm274_vm12, %v268_v14, %v285_v30  ;;  %v1530_v17 = vld [vmem:[#allocation5 + $0xc0] sm:$0xf] }
  0xc4   :  { %v313_v38 = vand.u32 65535, %v283_v26  ;;  %v287_v34 = vsel %vm273_vm13, %v284_v23, %v286_v32  ;;  %v290_v35 = vshrl.u32 %v1943_v50, 16  ;;  %v314_v43 = vshrl.u32 %v283_v26, 16  ;;  %v1658_v49 = vld [vmem:[#allocation5 + $0x1c0] sm:$0xf] }
  0xc5   :  { %vm181_vm14 = vc.u32 %v2019_v4, %v2008_v18  ;;  %v182_v51 = vadd.s32 1, %v178_v25  ;;  %v179_v44 = vmul.u32 %v1936_v42, %v125_v24  ;;  %v256_v45 = vshrl.u32 %v1863_v52, %v1955_v9  ;;  %v1532_v26 = vld [vmem:[#allocation5 + $0xd0] sm:$0xf0] }
  0xc6   :  { %v291_v47 = vand.u32 65535, %v287_v34  ;;  %v292_v53 = vshrl.u32 %v287_v34, 16  ;;  %v2044_v54 = vmul.u32 %v314_v43, %v289_v33  ;;  %v2046_v55 = vmul.u32 %v313_v38, %v290_v35 }
  0xc7   :  { %v183_v46 = vsel %vm181_vm14, %v182_v51, %v178_v25  ;;  %v2048_v57 = vor.u32 %v1718_v41, %v1546_v39  ;;  %v2053_v60 = vsel %vm272_vm10, %v256_v45, %v1985_v37  ;;  %v277_v52 = vsel %vm275_vm11, %v265_v3, 2102212464  ;;  %v1674_v37 = vld [vmem:[#allocation5 + $0x1e0] sm:$0xf]  ;;  %v1716_v3 = vld [vmem:[#allocation5 + $0xe4] sm:$0xf] }
  0xc8   :  { %v184_v59 = vadd.s32 %v183_v46, %v179_v44  ;;  %v2055_v62 = vmul.u32 %v292_v53, %v289_v33  ;;  %v2057_v42 = vmul.u32 %v291_v47, %v290_v35  ;;  %v315_v9 = vmul.u32 %v313_v38, %v289_v33  ;;  %v1712_v25 = vld [vmem:[#allocation5 + $0xc4] sm:$0xf]  ;;  %v1660_v39 = vld [vmem:[#allocation5 + $0x1d0] sm:$0xf0]  ;;  %v1710_v44 = vld [vmem:[#allocation5 + $0xac] sm:$0xf0] }
  0xc9   :  { %v318_v63 = vmul.u32 %v314_v43, %v290_v35  ;;  %v319_v2 = vshll.u32 %v2044_v54, 16  ;;  %1132 = vmatpush.bf16.msra.mxu0 %v2048_v57  ;;  %v293_v6 = vmul.u32 %v291_v47, %v289_v33  ;;  %v296_v58 = vmul.u32 %v292_v53, %v290_v35  ;;  %v1744_v38 = vld [vmem:[#allocation5 + $0x1c4] sm:$0xf]  ;;  %v1514_v43 = vld [vmem:[#allocation5 + $0xa0] sm:$0xf] }
  0xca   :  { %v185_v5 = vadd.s32 536870912, %v184_v59  ;;  %v297_v7 = vshll.u32 %v2055_v62, 16  ;;  %v299_v56 = vshll.u32 %v2057_v42, 16  ;;  %v321_v8 = vshll.u32 %v2046_v55, 16  ;;  %v1642_v46 = vld [vmem:[#allocation5 + $0x1a0] sm:$0xf] }
  0xcb   :  { %vm323_vm15 = vc.u32 %v315_v9, %v319_v2  ;;  %v325_v10 = vadd.s32 %v319_v2, %v315_v9  ;;  %v278_v61 = vsel %vm274_vm12, %v1988_v40, %v277_v52  ;;  %v320_v24 = vshrl.u32 %v2044_v54, 16  ;;  %v1742_v54 = vld [vmem:[#allocation5 + $0x1ac] sm:$0xf0]  ;;  %v1708_v52 = vld [vmem:[#allocation5 + $0xa4] sm:$0xf] }
  0xcc   :  { %v2066_v12 = vshrl.u32 %v185_v5, 30  ;;  %vm301_vm0 = vc.u32 %v293_v6, %v297_v7  ;;  %v303_v13 = vadd.s32 %v297_v7, %v293_v6  ;;  %v324_v14 = vsel %vm323_vm15, 1, %v1862_v0  ;;  %v1516_v9 = vld [vmem:[#allocation5 + $0xb0] sm:$0xf0] }
  0xcd   :  { %v302_v20 = vsel %vm301_vm0, 1, %v1862_v0  ;;  %v326_v21 = vadd.s32 %v324_v14, %v318_v63  ;;  %vm327_vm1 = vc.u32 %v325_v10, %v321_v8  ;;  %v2077_v33 = vor.u32 %v1750_v48, %v1674_v37  ;;  %v1644_v48 = vld [vmem:[#allocation5 + $0x1b0] sm:$0xf0] }
  0xce   :  { %v187_v22 = vshll.u32 %v2066_v12, 30  ;;  %v304_v23 = vadd.s32 %v302_v20, %v296_v58  ;;  %vm305_vm2 = vc.u32 %v303_v13, %v299_v56  ;;  %v328_v32 = vsel %vm327_vm1, 1, %v1862_v0  ;;  %v1740_v58 = vld [vmem:[#allocation5 + $0x1a4] sm:$0xf]  ;;  %v1706_v56 = vld [vmem:[#allocation5 + $0x8c] sm:$0xf0] }
  0xcf   :  { %v306_v30 = vsel %vm305_vm2, 1, %v1862_v0  ;;  %v2079_v40 = vor.u32 %v1716_v3, %v1548_v11  ;;  %v298_v51 = vshrl.u32 %v2055_v62, 16  ;;  %v330_v35 = vadd.s32 %v328_v32, %v326_v21  ;;  %1146 = vmatpush.bf16.msra.mxu1 %v2077_v33  ;;  %v1736_v21 = vld [vmem:[#allocation5 + $0x184] sm:$0xf]  ;;  %v1734_v32 = vld [vmem:[#allocation5 + $0x16c] sm:$0xf0] }
  0xd0   :  { %v2081_v41 = vsub.s32 %v184_v59, %v187_v22  ;;  %v308_v34 = vadd.s32 %v306_v30, %v304_v23  ;;  %v300_v45 = vshrl.u32 %v2057_v42, 16  ;;  %v2087_v0 = vor.u32 %v1748_v15, %v1676_v16  ;;  %v1626_v15 = vld [vmem:[#allocation5 + $0x180] sm:$0xf]  ;;  %v1500_v16 = vld [vmem:[#allocation5 + $0x90] sm:$0xf0] }
  0xd1   :  { %1160 = vmatpush.bf16.msra.mxu2 %v2079_v40  ;;  %v2089_v47 = vor.u32 %v1714_v19, %v1530_v17  ;;  %v2091_v53 = vor.u32 %v1746_v1, %v1658_v49  ;;  %v279_v62 = vsel %vm273_vm13, %v2053_v60, %v278_v61  ;;  %v322_v63 = vshrl.u32 %v2046_v55, 16  ;;  %v1498_v55 = vld [vmem:[#allocation5 + $0x80] sm:$0xf]  ;;  %v1628_v49 = vld [vmem:[#allocation5 + $0x190] sm:$0xf0] }
  0xd2   :  { %vm189_vm3 = vcmp.lt.s32.totalorder %v2081_v41, 0  ;;  %v190_v59 = vsub.s32 0, %v2081_v41  ;;  %v309_v42 = vadd.s32 %v308_v34, %v298_v51  ;;  %v331_v2 = vadd.s32 %v330_v35, %v320_v24  ;;  %1174 = vmatpush.bf16.msra.mxu3 %v2087_v0  ;;  %v1482_v22 = vld [vmem:[#allocation5 + $0x60] sm:$0xf]  ;;  %v1702_v23 = vld [vmem:[#allocation5 + $0x6c] sm:$0xf0] }
  0xd3   :  { %1133 = vmatpush.bf16.msra.mxu0 %v2089_v47  ;;  %v2101_v5 = vor.u32 %v1712_v25, %v1532_v26  ;;  %v2103_v6 = vor.u32 %v1744_v38, %v1660_v39  ;;  %v2108_v36 = vadd.s32 %v325_v10, %v321_v8  ;;  %v2110_v60 = vor.u32 %v1710_v44, %v1514_v43  ;;  %v1738_v8 = vld [vmem:[#allocation5 + $0x18c] sm:$0xf0]  ;;  %v1704_v10 = vld [vmem:[#allocation5 + $0x84] sm:$0xf]  ;;  %v1610_v24 = vld [vmem:[#allocation5 + $0x160] sm:$0xf] }
  0xd4   :  { %v191_v7 = vsel %vm189_vm3, %v190_v59, %v2081_v41  ;;  %v2106_v37 = vadd.s32 %v309_v42, %v300_v45  ;;  %v332_v11 = vadd.s32 %v331_v2, %v322_v63  ;;  %1147 = vmatpush.bf16.msra.mxu1 %v2091_v53  ;;  %v2114_v13 = vor.u32 %v1742_v54, %v1642_v46  ;;  %v1700_v38 = vld [vmem:[#allocation5 + $0x64] sm:$0xf]  ;;  %v1484_v34 = vld [vmem:[#allocation5 + $0x70] sm:$0xf0]  ;;  %v1466_v59 = vld [vmem:[#allocation5 + $0x40] sm:$0xf] }
  0xd5   :  { %v192_v3 = vclz %v191_v7  ;;  %1161 = vmatpush.bf16.msra.mxu2 %v2101_v5  ;;  %v2116_v14 = vor.u32 %v1708_v52, %v1516_v9  ;;  %v2122_v61 = vor.u32 %v1740_v58, %v1644_v48  ;;  %v2124_v20 = vor.u32 %v1706_v56, %v1498_v55  ;;  %v1732_v35 = vld [vmem:[#allocation5 + $0x164] sm:$0xf]  ;;  %v1612_v54 = vld [vmem:[#allocation5 + $0x170] sm:$0xf0]  ;;  %v1730_v58 = vld [vmem:[#allocation5 + $0x14c] sm:$0xf0] }
  0xd6   :  { %vm335_vm4 = vc.u32 %v2106_v37, %v2108_v36  ;;  %v336_v19 = vadd.s32 1, %v332_v11  ;;  %1175 = vmatpush.bf16.msra.mxu3 %v2103_v6  ;;  %v333_v1 = vmul.u32 %v1943_v50, %v279_v62  ;;  %v2132_v26 = vor.u32 %v1738_v8, %v1626_v15  ;;  %v1696_v7 = vld [vmem:[#allocation5 + $0x44] sm:$0xf]  ;;  %v1468_v55 = vld [vmem:[#allocation5 + $0x50] sm:$0xf0] }
  0xd7   :  { %v1421_v17 = vadd.s32 4294967294, %v192_v3  ;;  %1134 = vmatpush.bf16.msra.mxu0 %v2110_v60  ;;  %v2134_v30 = vor.u32 %v1704_v10, %v1500_v16  ;;  %v180_v50 = vadd.s32 %v2008_v18, %v2019_v4  ;;  %v2140_v45 = vor.u32 %v1736_v21, %v1628_v49  ;;  %v1698_v18 = vld [vmem:[#allocation5 + $0x4c] sm:$0xf0]  ;;  %v1594_v4 = vld [vmem:[#allocation5 + $0x140] sm:$0xf] }
  0xd8   :  { %v337_v25 = vsel %vm335_vm4, %v336_v19, %v332_v11  ;;  %1148 = vmatpush.bf16.msra.mxu1 %v2114_v13  ;;  %v2142_v46 = vor.u32 %v1702_v23, %v1482_v22  ;;  %v2144_v42 = vor.u32 %v1734_v32, %v1610_v24  ;;  %v2149_v2 = vor.u32 %v1700_v38, %v1484_v34  ;;  %v1728_v56 = vld [vmem:[#allocation5 + $0x144] sm:$0xf]  ;;  %v1596_v8 = vld [vmem:[#allocation5 + $0x150] sm:$0xf0]  ;;  %v1450_v10 = vld [vmem:[#allocation5 + $0x20] sm:$0xf] }
  0xd9   :  { %vm1422_vm5 = vcmp.lt.s32.totalorder %v1421_v17, 0  ;;  %1162 = vmatpush.bf16.msra.mxu2 %v2116_v14  ;;  %v338_v51 = vadd.s32 %v337_v25, %v333_v1  ;;  %v2157_v15 = vor.u32 %v1698_v18, %v1466_v59  ;;  %vm88_vm6 = vcmp.lt.s32.totalorder %v1924_v27, 0  ;;  %v1578_v19 = vld [vmem:[#allocation5 + $0x120] sm:$0xf]  ;;  %v1726_v23 = vld [vmem:[#allocation5 + $0x12c] sm:$0xf0] }
  0xda   :  { %v195_v39 = vsel %vm1422_vm5, 0, %v1421_v17  ;;  %1176 = vmatpush.bf16.msra.mxu3 %v2122_v61  ;;  %v1694_v17 = vld [vmem:[#allocation5 + $0x2c] sm:$0xf0]  ;;  %vm2163_vm7 = vcmp.le.f32.partialorder %v86_v29, 0.7853982  ;;  %v2169_v1 = vor.u32 %v1730_v58, %v1594_v4  ;;  %v2171_v22 = vor.u32 %v1696_v7, %v1468_v55 }
  0xdb   :  { %v196_v43 = vsub.s32 32, %v195_v39  ;;  %v200_v44 = vsub.s32 4294967266, %v195_v39  ;;  %1135 = vmatpush.bf16.msra.mxu0 %v2124_v20  ;;  %v339_v62 = vadd.s32 536870912, %v338_v51  ;;  %v197_v52 = vshll.u32 %v2081_v41, %v195_v39  ;;  %v1692_v24 = vld [vmem:[#allocation5 + $0x24] sm:$0xf] }
  0xdc   :  { %1149 = vmatpush.bf16.msra.mxu1 %v2132_v26  ;;  %v2155_v41 = vor.u32 %v1732_v35, %v1612_v54  ;;  %v1452_v32 = vld [vmem:[#allocation5 + $0x30] sm:$0xf0]  ;;  %v1724_v38 = vld [vmem:[#allocation5 + $0x124] sm:$0xf]  ;;  %v2177_v34 = vor.u32 %v1728_v56, %v1596_v8  ;;  %v2179_v35 = vor.u32 %v1694_v17, %v1450_v10  ;;  %v1562_v54 = vld [vmem:[#allocation5 + $0x100] sm:$0xf]  ;;  %v2185_v4 = vor.u32 %v1726_v23, %v1578_v19 }
  0xdd   :  { %v198_v9 = vshrl.u32 %v180_v50, %v196_v43  ;;  %v201_v63 = vadd.s32 127, %v200_v44  ;;  %1163 = vmatpush.bf16.msra.mxu2 %v2134_v30  ;;  %v2151_v48 = vshrl.u32 %v339_v62, 30  ;;  %v1580_v50 = vld [vmem:[#allocation5 + $0x130] sm:$0xf0]  ;;  %v1434_v43 = vld [vmem:[#allocation5] sm:$0xf]  ;;  %vm229_vm12 = vweird.f32 %v1924_v27 }
  0xde   :  { %1177 = vmatpush.bf16.msra.mxu3 %v2140_v45  ;;  %v1690_v44 = vld [vmem:[#allocation5 + $0xc] sm:$0xf0]  ;;  %v1688_v62 = vld [vmem:[#allocation5 + $0x4] sm:$0xf]  ;;  %2525 = vst [vmem:[#allocation11_spill] sm:$0xff] %v2185_v4  ;;  %v2192_v10 = vor.u32 %v1724_v38, %v1580_v50  ;;  %vm242_vm10 = vcmp.lt.s32.totalorder %v1926_v28, 0  ;;  %vm383_vm15 = vweird.f32 %v1926_v28 }
  0xdf   :  { %v199_v3 = vor.u32 %v198_v9, %v197_v52  ;;  %v202_v11 = vshll.u32 %v201_v63, 23  ;;  %1136 = vmatpush.bf16.msra.mxu0 %v2142_v46  ;;  %v341_v16 = vshll.u32 %v2151_v48, 30  ;;  %v1722_v59 = vld [vmem:[#allocation5 + $0x10c] sm:$0xf0]  ;;  %v2187_v52 = vor.u32 %v1692_v24, %v1452_v32  ;;  %v1436_v9 = vld [vmem:[#allocation5 + $0x10] sm:$0xf0] }
  0xe0   :  { %1150 = vmatpush.bf16.msra.mxu1 %v2144_v42  ;;  %v1554_v63 = vld [vmem:[#allocation5 + $0xe8] sm:$0xf]  ;;  %v1719_v58 = vld [vmem:[#allocation5 + $0xf4] sm:$0xf0]  ;;  %v1720_v55 = vld [vmem:[#allocation5 + $0x104] sm:$0xf]  ;;  %v2204_v38 = vor.u32 %v1688_v62, %v1436_v9 }
  0xe1   :  { %v203_v49 = vor.u32 4788187, %v202_v11  ;;  %1164 = vmatpush.bf16.msra.mxu2 %v2149_v2  ;;  %v2173_v25 = vsub.s32 %v338_v51, %v341_v16  ;;  %v206_v39 = vcvt.s32.f32 %v199_v3  ;;  %v1682_v56 = vld [vmem:[#allocation5 + $0x1e8] sm:$0xf]  ;;  %v1751_v3 = vld [vmem:[#allocation5 + $0x1f4] sm:$0xf0]  ;;  %v2194_v16 = vor.u32 %v1690_v44, %v1434_v43 }
  0xe2   :  { %1178 = vmatpush.bf16.msra.mxu3 %v2155_v41  ;;  %2526 = vst [vmem:[#allocation12_spill] sm:$0xff] %v2192_v10  ;;  %v1717_v17 = vld [vmem:[#allocation5 + $0xec] sm:$0xf]  ;;  %v1556_v19 = vld [vmem:[#allocation5 + $0xf8] sm:$0xf0]  ;;  %v2196_v23 = vor.u32 %v1719_v58, %v1554_v63  ;;  %v2211_v63 = vor.u32 %v1751_v3, %v1682_v56  ;;  %v210_v56 = vsub.s32 4, %v2066_v12 }
  0xe3   :  { %v204_v29 = vand.u32 2147483647, %v203_v49  ;;  %1137 = vmatpush.bf16.msra.mxu0 %v2157_v15  ;;  %vm343_vm8 = vcmp.lt.s32.totalorder %v2173_v25, 0  ;;  %v344_v51 = vsub.s32 0, %v2173_v25  ;;  %2527 = vst [vmem:[#allocation13_spill] sm:$0xff] %v2194_v16  ;;  %v2213_v58 = vor.u32 %v1717_v17, %v1556_v19 }
  0xe4   :  { %1151 = vmatpush.bf16.msra.mxu1 %v2169_v1  ;;  %v1564_v49 = vld [vmem:[#allocation5 + $0x110] sm:$0xf0]  ;;  %2528 = vst [vmem:[#allocation14_spill] sm:$0xff] %v2196_v23  ;;  %v1749_v24 = vld [vmem:[#allocation5 + $0x1ec] sm:$0xf] }
  0xe5   :  { %v207_v18 = vmul.f32 %v206_v39, %v204_v29  ;;  %1165 = vmatpush.bf16.msra.mxu2 %v2171_v22  ;;  %v345_v7 = vsel %vm343_vm8, %v344_v51, %v2173_v25  ;;  %v1684_v32 = vld [vmem:[#allocation5 + $0x1f8] sm:$0xf0]  ;;  %v2202_v51 = vor.u32 %v1722_v59, %v1562_v54  ;;  %v1538_v50 = vld [vmem:[#allocation5 + $0xc8] sm:$0xf]  ;;  %v1715_v43 = vld [vmem:[#allocation5 + $0xd4] sm:$0xf0]  ;;  %v2221_v59 = vor.u32 %v1720_v55, %v1564_v49 }
  0xe6   :  { %v346_v8 = vclz %v345_v7  ;;  %1179 = vmatpush.bf16.msra.mxu3 %v2177_v34  ;;  %2530 = vst [vmem:[#allocation16_spill] sm:$0xff] %v2211_v63  ;;  %v1747_v7 = vld [vmem:[#allocation5 + $0x1d4] sm:$0xf0]  ;;  %v1540_v62 = vld [vmem:[#allocation5 + $0xd8] sm:$0xf0]  ;;  %v2227_v17 = vor.u32 %v1715_v43, %v1538_v50 }
  0xe7   :  { %v208_v11 = vxor.u32 2147483648, %v207_v18  ;;  %1138 = vmatpush.bf16.msra.mxu0 %v2179_v35  ;;  %2529 = vst [vmem:[#allocation15_spill] sm:$0xff] %v2202_v51  ;;  %v1745_v9 = vld [vmem:[#allocation5 + $0x1cc] sm:$0xf]  ;;  %v1668_v19 = vld [vmem:[#allocation5 + $0x1d8] sm:$0xf0] }
  0xe8   :  { %v1424_v39 = vadd.s32 4294967294, %v346_v8  ;;  %1152 = vmatpush.bf16.msra.mxu1 %v2185_v4  ;;  %2531 = vst [vmem:[#allocation17_spill] sm:$0xff] %v2213_v58  ;;  %v2225_v8 = vor.u32 %v1749_v24, %v1684_v32  ;;  %v1650_v50 = vld [vmem:[#allocation5 + $0x1a8] sm:$0xf]  ;;  %v1743_v43 = vld [vmem:[#allocation5 + $0x1b4] sm:$0xf0] }
  0xe9   :  { %v209_v29 = vsel %vm88_vm6, %v208_v11, %v207_v18  ;;  %1166 = vmatpush.bf16.msra.mxu2 %v2187_v52  ;;  %v1666_v18 = vld [vmem:[#allocation5 + $0x1c8] sm:$0xf]  ;;  %v1713_v11 = vld [vmem:[#allocation5 + $0xcc] sm:$0xf]  ;;  %2532 = vst [vmem:[#allocation18_spill] sm:$0xff] %v2221_v59 }
  0xea   :  { %v2209_v44 = vsel %vm2163_vm7, %v1924_v27, %v209_v29  ;;  %vm1425_vm9 = vcmp.lt.s32.totalorder %v1424_v39, 0  ;;  %1180 = vmatpush.bf16.msra.mxu3 %v2192_v10  ;;  %2533 = vst [vmem:[#allocation19_spill] sm:$0xff] %v2225_v8  ;;  %v1522_v29 = vld [vmem:[#allocation5 + $0xa8] sm:$0xf]  ;;  %v2236_v24 = vor.u32 %v1747_v7, %v1666_v18  ;;  %v2238_v32 = vor.u32 %v1713_v11, %v1540_v62  ;;  %v1741_v7 = vld [vmem:[#allocation5 + $0x1ac] sm:$0xf] }
  0xeb   :  { %v2217_v54 = vmul.f32 %v2209_v44, %v2209_v44  ;;  %1139 = vmatpush.bf16.msra.mxu0 %v2194_v16  ;;  %v349_v3 = vsel %vm1425_vm9, 0, %v1424_v39  ;;  %2534 = vst [vmem:[#allocation20_spill] sm:$0xff] %v2227_v17  ;;  %v334_v16 = vadd.s32 %v2108_v36, %v2106_v37  ;;  %v1711_v39 = vld [vmem:[#allocation5 + $0xb4] sm:$0xf0]  ;;  %v1652_v11 = vld [vmem:[#allocation5 + $0x1b8] sm:$0xf0] }
  0xec   :  { %v350_v55 = vsub.s32 32, %v349_v3  ;;  %v354_v49 = vsub.s32 4294967266, %v349_v3  ;;  %1153 = vmatpush.bf16.msra.mxu1 %v2202_v51  ;;  %2535 = vst [vmem:[#allocation21_spill] sm:$0xff] %v2236_v24  ;;  %v351_v37 = vshll.u32 %v2173_v25, %v349_v3  ;;  %v1524_v51 = vld [vmem:[#allocation5 + $0xb8] sm:$0xf0]  ;;  %v2246_v18 = vor.u32 %v1711_v39, %v1522_v29 }
  0xed   :  { %v222_v31 = vmul.f32 -0.00019511016, %v2217_v54  ;;  %1167 = vmatpush.bf16.msra.mxu2 %v2204_v38  ;;  %2536 = vst [vmem:[#allocation22_spill] sm:$0xff] %v2238_v32  ;;  %v1506_v25 = vld [vmem:[#allocation5 + $0x88] sm:$0xf]  ;;  %v364_v3 = vsub.s32 4, %v2151_v48 }
  0xee   :  { %v352_v36 = vshrl.u32 %v334_v16, %v350_v55  ;;  %v355_v4 = vadd.s32 127, %v354_v49  ;;  %1181 = vmatpush.bf16.msra.mxu3 %v2221_v59  ;;  %2538 = vst [vmem:[#allocation24_spill] sm:$0xff] %v2246_v18  ;;  %v1707_v16 = vld [vmem:[#allocation5 + $0x94] sm:$0xf0]  ;;  %v2252_v55 = vor.u32 %v1743_v43, %v1650_v50  ;;  %v1508_v39 = vld [vmem:[#allocation5 + $0x98] sm:$0xf0] }
  0xef   :  { %1188 = vmatpush.bf16.msrb.mxu0 %v2196_v23  ;;  %v1709_v23 = vld [vmem:[#allocation5 + $0xac] sm:$0xf]  ;;  %v223_v10 = vadd.f32 0.008332121, %v222_v31  ;;  %v1739_v29 = vld [vmem:[#allocation5 + $0x194] sm:$0xf0]  ;;  %v2263_v50 = vor.u32 %v1707_v16, %v1506_v25 }
  0xf0   :  { %1202 = vmatpush.bf16.msrb.mxu1 %v2211_v63  ;;  %v2244_v63 = vor.u32 %v1745_v9, %v1668_v19  ;;  %v353_v31 = vor.u32 %v352_v36, %v351_v37  ;;  %2539 = vst [vmem:[#allocation25_spill] sm:$0xff] %v2252_v55  ;;  %v2254_v9 = vor.u32 %v1709_v23, %v1524_v51  ;;  %v1634_v19 = vld [vmem:[#allocation5 + $0x188] sm:$0xf]  ;;  %v1737_v23 = vld [vmem:[#allocation5 + $0x18c] sm:$0xf] }
  0xf1   :  { %1216 = vmatpush.bf16.msrb.mxu2 %v2213_v58  ;;  %v224_v62 = vmul.f32 %v223_v10, %v2217_v54  ;;  %v356_v58 = vshll.u32 %v355_v4, 23  ;;  %v211_v10 = vsel %vm88_vm6, %v210_v56, %v2066_v12  ;;  %v1705_v4 = vld [vmem:[#allocation5 + $0x8c] sm:$0xf]  ;;  %v2261_v36 = vor.u32 %v1741_v7, %v1652_v11  ;;  %2542 = vst [vmem:[#allocation28_spill] sm:$0xff] %v2263_v50  ;;  %v1636_v51 = vld [vmem:[#allocation5 + $0x198] sm:$0xf0] }
  0xf2   :  { %1230 = vmatpush.bf16.msrb.mxu3 %v2225_v8  ;;  %2537 = vst [vmem:[#allocation23_spill] sm:$0xff] %v2244_v63  ;;  %v2267_v12 = vsel %vm2163_vm7, 0, %v211_v10  ;;  %v2274_v56 = vor.u32 %v1705_v4, %v1508_v39  ;;  %v1618_v7 = vld [vmem:[#allocation5 + $0x168] sm:$0xf]  ;;  %v1701_v21 = vld [vmem:[#allocation5 + $0x6c] sm:$0xf] }
  0xf3   :  { %1189 = vmatpush.bf16.msrb.mxu0 %v2227_v17  ;;  %2540 = vst [vmem:[#allocation26_spill] sm:$0xff] %v2254_v9  ;;  %v357_v49 = vor.u32 4788187, %v356_v58  ;;  %v225_v37 = vadd.f32 -0.16666654, %v224_v62  ;;  %v2272_v58 = vor.u32 %v1739_v29, %v1634_v19  ;;  %v365_v62 = vsel %vm242_vm10, %v364_v3, %v2151_v48 }
  0xf4   :  { %1203 = vmatpush.bf16.msrb.mxu1 %v2236_v24  ;;  %2541 = vst [vmem:[#allocation27_spill] sm:$0xff] %v2261_v36  ;;  %v360_v24 = vcvt.s32.f32 %v353_v31  ;;  %v1703_v17 = vld [vmem:[#allocation5 + $0x74] sm:$0xf0]  ;;  %v1492_v25 = vld [vmem:[#allocation5 + $0x78] sm:$0xf0]  ;;  %v230_v8 = vand.u32 3, %v2267_v12 }
  0xf5   :  { %1217 = vmatpush.bf16.msrb.mxu2 %v2238_v32  ;;  %v358_v43 = vand.u32 2147483647, %v357_v49  ;;  %v1490_v32 = vld [vmem:[#allocation5 + $0x68] sm:$0xf]  ;;  %2543 = vst [vmem:[#allocation29_spill] sm:$0xff] %v2272_v58  ;;  %v226_v16 = vmul.f32 %v225_v37, %v2217_v54 }
  0xf6   :  { %1231 = vmatpush.bf16.msrb.mxu3 %v2244_v63  ;;  %2544 = vst [vmem:[#allocation30_spill] sm:$0xff] %v2274_v56  ;;  %v1735_v31 = vld [vmem:[#allocation5 + $0x174] sm:$0xf0]  ;;  %v2545_v10 = vand.u32 2147483647, %v1926_v28  ;;  %v2290_v19 = vor.u32 %v1703_v17, %v1490_v32  ;;  %vm231_vm13 = vcmp.lt.s32.totalorder %v230_v8, 2 }
  0xf7   :  { %1190 = vmatpush.bf16.msrb.mxu0 %v2246_v18  ;;  %v361_v11 = vmul.f32 %v360_v24, %v358_v43  ;;  %v2288_v24 = vor.u32 %v1737_v23, %v1636_v51  ;;  %v1733_v48 = vld [vmem:[#allocation5 + $0x16c] sm:$0xf]  ;;  %v1620_v3 = vld [vmem:[#allocation5 + $0x178] sm:$0xf0]  ;;  %v1474_v4 = vld [vmem:[#allocation5 + $0x48] sm:$0xf]  ;;  %v2301_v23 = vor.u32 %v1701_v21, %v1492_v25 }
  0xf8   :  { %1204 = vmatpush.bf16.msrb.mxu1 %v2252_v55  ;;  %vm2282_vm11 = vcmp.le.f32.partialorder %v2545_v10, 0.7853982  ;;  %2549 = vst [vmem:[#allocation32_spill] sm:$0xff] %v2290_v19  ;;  %v1699_v39 = vld [vmem:[#allocation5 + $0x54] sm:$0xf0]  ;;  %v540_v43 = vadd.s32 3, %v2267_v12  ;;  %v2299_v10 = vor.u32 %v1735_v31, %v1618_v7  ;;  %v2312_v7 = vor.u32 %v1733_v48, %v1620_v3 }
  0xf9   :  { %1218 = vmatpush.bf16.msrb.mxu2 %v2254_v9  ;;  %2548 = vst [vmem:[#allocation31_spill] sm:$0xff] %v2288_v24  ;;  %v362_v29 = vxor.u32 2147483648, %v361_v11  ;;  %v2294_v37 = vsel %vm2282_vm11, 0, %v365_v62  ;;  %v1602_v17 = vld [vmem:[#allocation5 + $0x148] sm:$0xf]  ;;  %v227_v62 = vadd.f32 1.0, %v226_v16  ;;  %v2314_v31 = vor.u32 %v1699_v39, %v1474_v4 }
  0xfa   :  { %1232 = vmatpush.bf16.msrb.mxu3 %v2261_v36  ;;  %2550 = vst [vmem:[#allocation33_spill] sm:$0xff] %v2299_v10  ;;  %v1731_v32 = vld [vmem:[#allocation5 + $0x154] sm:$0xf0]  ;;  %v1476_v36 = vld [vmem:[#allocation5 + $0x58] sm:$0xf0]  ;;  %v695_v12 = vadd.s32 3, %v2294_v37 }
  0xfb   :  { %1191 = vmatpush.bf16.msrb.mxu0 %v2263_v50  ;;  %2551 = vst [vmem:[#allocation34_spill] sm:$0xff] %v2301_v23  ;;  %v363_v51 = vsel %vm242_vm10, %v362_v29, %v361_v11  ;;  %v1697_v50 = vld [vmem:[#allocation5 + $0x4c] sm:$0xf]  ;;  %v1604_v21 = vld [vmem:[#allocation5 + $0x158] sm:$0xf0]  ;;  %v2321_v49 = vor.u32 %v1731_v32, %v1602_v17  ;;  %vm232_vm14 = vcmp.eq.s32.totalorder %v230_v8, 0 }
  0xfc   :  { %1205 = vmatpush.bf16.msrb.mxu1 %v2272_v58  ;;  %v1729_v55 = vld [vmem:[#allocation5 + $0x14c] sm:$0xf]  ;;  %v2308_v9 = vsel %vm2282_vm11, %v1926_v28, %v363_v51  ;;  %2552 = vst [vmem:[#allocation35_spill] sm:$0xff] %v2312_v7  ;;  %v1458_v25 = vld [vmem:[#allocation5 + $0x28] sm:$0xf]  ;;  %v2323_v51 = vor.u32 %v1697_v50, %v1476_v36  ;;  %vm235_vm0 = vcmp.eq.s32.totalorder %v230_v8, 2 }
  0xfd   :  { %1219 = vmatpush.bf16.msrb.mxu2 %v2274_v56  ;;  %2553 = vst [vmem:[#allocation36_spill] sm:$0xff] %v2314_v31  ;;  %v368_v11 = vmul.f32 %v2308_v9, %v2308_v9  ;;  %v1695_v29 = vld [vmem:[#allocation5 + $0x34] sm:$0xf0]  ;;  %v1586_v16 = vld [vmem:[#allocation5 + $0x128] sm:$0xf]  ;;  %v2326_v56 = vmul.f32 %v227_v62, %v2209_v44  ;;  %v541_v44 = vand.u32 3, %v540_v43 }
  0xfe   :  { %1233 = vmatpush.bf16.msrb.mxu3 %v2288_v24  ;;  %v215_v58 = vmul.f32 -0.001358992, %v2217_v54  ;;  %v1727_v48 = vld [vmem:[#allocation5 + $0x134] sm:$0xf0]  ;;  %v1693_v3 = vld [vmem:[#allocation5 + $0x2c] sm:$0xf] }
  0xff   :  { %1192 = vmatpush.bf16.msrb.mxu0 %v2290_v19  ;;  %v1460_v4 = vld [vmem:[#allocation5 + $0x38] sm:$0xf0]  ;;  %v376_v39 = vmul.f32 -0.00019511016, %v368_v11  ;;  %v369_v24 = vmul.f32 -0.001358992, %v368_v11  ;;  %v2338_v62 = vor.u32 %v1727_v48, %v1586_v16 }
 0x100   :  { %1206 = vmatpush.bf16.msrb.mxu1 %v2299_v10  ;;  %v216_v19 = vadd.f32 0.041655596, %v215_v58  ;;  %v2330_v10 = vor.u32 %v1729_v55, %v1604_v21  ;;  %v1725_v17 = vld [vmem:[#allocation5 + $0x12c] sm:$0xf]  ;;  %v1588_v36 = vld [vmem:[#allocation5 + $0x138] sm:$0xf0]  ;;  %v2340_v55 = vor.u32 %v1693_v3, %v1460_v4 }
 0x101   :  { %1220 = vmatpush.bf16.msrb.mxu2 %v2301_v23  ;;  %v2332_v23 = vor.u32 %v1695_v29, %v1458_v25  ;;  %v1442_v50 = vld [vmem:[#allocation5 + $0x8] sm:$0xf]  ;;  %v377_v32 = vadd.f32 0.008332121, %v376_v39  ;;  %v1691_v18 = vld [vmem:[#allocation5 + $0x14] sm:$0xf0] }
 0x102   :  { %1234 = vmatpush.bf16.msrb.mxu3 %v2312_v7  ;;  %v217_v63 = vmul.f32 %v216_v19, %v2217_v54  ;;  %v370_v58 = vadd.f32 0.041655596, %v369_v24  ;;  %v1570_v21 = vld [vmem:[#allocation5 + $0x108] sm:$0xf]  ;;  %v1723_v25 = vld [vmem:[#allocation5 + $0x114] sm:$0xf0]  ;;  %v2346_v19 = vor.u32 %v1725_v17, %v1588_v36  ;;  %v2348_v43 = vor.u32 %v1691_v18, %v1442_v50 }
 0x103   :  { %1193 = vmatpush.bf16.msrb.mxu0 %v2314_v31  ;;  %v378_v29 = vmul.f32 %v377_v32, %v368_v11  ;;  %v1689_v31 = vld [vmem:[#allocation5 + $0xc] sm:$0xf]  ;;  %v1444_v39 = vld [vmem:[#allocation5 + $0x18] sm:$0xf0]  ;;  %v233_v24 = vxor.u32 2147483648, %v2326_v56  ;;  %v384_v32 = vand.u32 3, %v2294_v37 }
 0x104   :  { %1207 = vmatpush.bf16.msrb.mxu1 %v2321_v49  ;;  %v218_v7 = vadd.f32 -0.4999988, %v217_v63  ;;  %v371_v59 = vmul.f32 %v370_v58, %v368_v11  ;;  %2554 = vst [vmem:[#allocation37_spill] sm:$0xff] %v2348_v43  ;;  %v1721_v16 = vld [vmem:[#allocation5 + $0x10c] sm:$0xf]  ;;  %v2355_v58 = vor.u32 %v1723_v25, %v1570_v21  ;;  %v2357_v17 = vor.u32 %v1689_v31, %v1444_v39  ;;  %v2380_v8 = vld [vmem:[#allocation2 + $0x20] sm:$0xff] }
 0x105   :  { %1221 = vmatpush.bf16.msrb.mxu2 %v2323_v51  ;;  %v379_v48 = vadd.f32 -0.16666654, %v378_v29  ;;  %v1572_v3 = vld [vmem:[#allocation5 + $0x118] sm:$0xf0]  ;;  %v696_v29 = vand.u32 3, %v695_v12  ;;  %vm543_vm1 = vcmp.eq.s32.totalorder %v541_v44, 0 }
 0x106   :  { %1235 = vmatpush.bf16.msrb.mxu3 %v2330_v10  ;;  %v219_v63 = vmul.f32 %v218_v7, %v2217_v54  ;;  %v372_v4 = vadd.f32 -0.4999988, %v371_v59  ;;  %2555 = vst [vmem:[#allocation38_spill] sm:$0xff] %v2355_v58  ;;  %v2362_v54 = vor.u32 %v1721_v16, %v1572_v3  ;;  %vm542_vm2 = vcmp.lt.s32.totalorder %v541_v44, 2 }
 0x107   :  { %1194 = vmatpush.bf16.msrb.mxu0 %v2332_v23  ;;  %2556 = vst [vmem:[#allocation39_spill] sm:$0xff] %v2357_v17  ;;  %v380_v18 = vmul.f32 %v379_v48, %v368_v11  ;;  %vm546_vm3 = vcmp.eq.s32.totalorder %v541_v44, 2  ;;  %vm385_vm4 = vcmp.lt.s32.totalorder %v384_v32, 2  ;;  %vm386_vm5 = vcmp.eq.s32.totalorder %v384_v32, 0 }
 0x108   :  { %1208 = vmatpush.bf16.msrb.mxu1 %v2338_v62  ;;  %v220_v36 = vadd.f32 1.0, %v219_v63  ;;  %v373_v50 = vmul.f32 %v372_v4, %v368_v11  ;;  %2557 = vst [vmem:[#allocation40_spill] sm:$0xff] %v2362_v54  ;;  %vm389_vm6 = vcmp.eq.s32.totalorder %v384_v32, 2  ;;  %vm697_vm7 = vcmp.lt.s32.totalorder %v696_v29, 2  ;;  %v2378_v4 = vld [vmem:[#allocation2] sm:$0xff]  ;;  %v1777_v32 = vld [vmem:[%s2488_s1 + $0x8] sm:$0xff] }
 0x109   :  { %1222 = vmatpush.bf16.msrb.mxu2 %v2340_v55  ;;  %v381_v59 = vadd.f32 1.0, %v380_v18  ;;  %vm698_vm8 = vcmp.eq.s32.totalorder %v696_v29, 0  ;;  %vm701_vm9 = vcmp.eq.s32.totalorder %v696_v29, 2  ;;  %v2382_v18 = vld [vmem:[#allocation2 + $0x10] sm:$0xff] }
 0x10a   :  { %1236 = vmatpush.bf16.msrb.mxu3 %v2346_v19  ;;  %v234_v37 = vsel %vm232_vm14, %v220_v36, %v233_v24  ;;  %v236_v7 = vxor.u32 2147483648, %v220_v36  ;;  %v545_v31 = vsel %vm543_vm1, %v220_v36, %v233_v24  ;;  %v374_v11 = vadd.f32 1.0, %v373_v50  ;;  %v2384_v36 = vld [vmem:[#allocation2 + $0x30] sm:$0xff] }
 0x10b   :  { %1195 = vmatpush.bf16.msrb.mxu0 %v2348_v43  ;;  %v382_v21 = vmul.f32 %v381_v59, %v2308_v9  ;;  %v1776_v9 = vld [vmem:[%s2488_s1] sm:$0xff] }
 0x10c   :  { %1209 = vmatpush.bf16.msrb.mxu1 %v2355_v58  ;;  %v237_v25 = vsel %vm235_vm0, %v236_v7, %v2326_v56  ;;  %v548_v39 = vsel %vm546_vm3, %v236_v7, %v2326_v56  ;;  %v390_v16 = vxor.u32 2147483648, %v374_v11 }
 0x10d   :  { %1223 = vmatpush.bf16.msrb.mxu2 %v2357_v17  ;;  %v238_v12 = vsel %vm231_vm13, %v234_v37, %v237_v25  ;;  %v549_v24 = vsel %vm542_vm2, %v545_v31, %v548_v39  ;;  %v387_v48 = vxor.u32 2147483648, %v382_v21 }
 0x10e   :  { %1237 = vmatpush.bf16.msrb.mxu3 %v2362_v54  ;;  %v239_v44 = vsel %vm229_vm12, nan, %v238_v12  ;;  %v550_v3 = vsel %vm229_vm12, nan, %v549_v24  ;;  %v391_v50 = vsel %vm389_vm6, %v390_v16, %v382_v21  ;;  %v703_v37 = vsel %vm701_vm9, %v390_v16, %v382_v21 }
 0x10f   :  { %v394_v56 = vmul.f32 %v1776_v9, %v239_v44  ;;  %v706_v63 = vmul.f32 %v1776_v9, %v550_v3  ;;  %v388_v27 = vsel %vm386_vm5, %v374_v11, %v387_v48  ;;  %v700_v59 = vsel %vm698_vm8, %v374_v11, %v387_v48  ;;  %v709_v3 = vld [vmem:[#allocation2 + $0x8] sm:$0xff] }
 0x110   :  { %v392_v25 = vsel %vm385_vm4, %v388_v27, %v391_v50  ;;  %v704_v39 = vsel %vm697_vm7, %v700_v59, %v703_v37  ;;  %v715_v27 = vld [vmem:[#allocation2 + $0x38] sm:$0xff] }
 0x111   :  { %v2388_v7 = vperm.slane %v394_v56, 0  ;;  %v722_v31 = vperm.slane %v706_v63, 0  ;;  %v393_v12 = vsel %vm383_vm15, nan, %v392_v25  ;;  %v705_v24 = vsel %vm383_vm15, nan, %v704_v39  ;;  %v711_v56 = vld [vmem:[#allocation2 + $0x28] sm:$0xff]  ;;  %v713_v63 = vld [vmem:[#allocation2 + $0x18] sm:$0xff] }
 0x112   :  { %v395_v29 = vmul.f32 %v1777_v32, %v393_v12  ;;  %v707_v48 = vmul.f32 %v1777_v32, %v705_v24  ;;  %v2576_v24 = vld [vmem:[#allocation30_spill] sm:$0xff] }
 0x113   :  { %v718_v44 = vmul.f32 %v2388_v7, %v2378_v4  ;;  %v720_v11 = vmul.f32 %v2388_v7, %v2380_v8  ;;  %v724_v21 = vmul.f32 %v722_v31, %v2382_v18  ;;  %v726_v16 = vmul.f32 %v722_v31, %v2384_v36  ;;  %v2580_v32 = vld [vmem:[#allocation34_spill] sm:$0xff] }
 0x114   :  { %v717_v50 = vperm.slane %v395_v29, 0  ;;  %v723_v59 = vperm.slane %v707_v48, 0  ;;  %v2581_v29 = vld [vmem:[#allocation33_spill] sm:$0xff]  ;;  %v2582_v48 = vld [vmem:[#allocation35_spill] sm:$0xff] }
 0x115   :  { %v728_v9 = vsub.f32 %v718_v44, %v724_v21  ;;  %v730_v28 = vsub.f32 %v720_v11, %v726_v16  ;;  %v2577_v44 = vld [vmem:[#allocation29_spill] sm:$0xff]  ;;  %v2578_v11 = vld [vmem:[#allocation31_spill] sm:$0xff]  ;;  %v2579_v16 = vld [vmem:[#allocation32_spill] sm:$0xff] }
 0x116   :  { %v719_v25 = vmul.f32 %v717_v50, %v709_v3  ;;  %v721_v39 = vmul.f32 %v717_v50, %v711_v56  ;;  %v725_v54 = vmul.f32 %v723_v59, %v713_v63  ;;  %v727_v58 = vmul.f32 %v723_v59, %v715_v27 }
 0x117   :  { %v732_v37 = vpack.c.bf16 %v730_v28, %v728_v9  ;;  %v2584_v9 = vld [vmem:[#allocation37_spill] sm:$0xff]  ;;  %v2585_v28 = vld [vmem:[#allocation39_spill] sm:$0xff] }
 0x118   :  { %v729_v17 = vsub.f32 %v719_v25, %v725_v54  ;;  %v731_v43 = vsub.f32 %v721_v39, %v727_v58  ;;  %v2570_v58 = vld [vmem:[#allocation23_spill] sm:$0xff]  ;;  %v2571_v54 = vld [vmem:[#allocation24_spill] sm:$0xff] }
 0x119   :  { %1140 = vmatmul.bf16.vlgmr.msra.gmra.mxu0 %v732_v37  ;;  %1168 = vmatmul.bf16.vlgmr.msra.gmra.mxu2 %v732_v37 }
 0x11a   :  { %1244 = vmatpush.bf16.msra.mxu0 %v2048_v57  ;;  %1272 = vmatpush.bf16.msra.mxu2 %v2079_v40  ;;  %v733_v12 = vpack.c.bf16 %v731_v43, %v729_v17  ;;  %v734_v57 = vmul.f32 %v722_v31, %v2378_v4  ;;  %v738_v40 = vmul.f32 %v2388_v7, %v2382_v18  ;;  %v2569_v43 = vld [vmem:[#allocation21_spill] sm:$0xff]  ;;  %v2572_v4 = vld [vmem:[#allocation26_spill] sm:$0xff] }
 0x11b   :  { %v2573_v18 = vld [vmem:[#allocation25_spill] sm:$0xff] }
 0x11c   :  { %1154 = vmatmul.bf16.vlgmr.msra.gmra.mxu1 %v733_v12  ;;  %1182 = vmatmul.bf16.vlgmr.msra.gmra.mxu3 %v733_v12 }
 0x11d   :  { %1258 = vmatpush.bf16.msra.mxu1 %v2077_v33  ;;  %1286 = vmatpush.bf16.msra.mxu3 %v2087_v0  ;;  %v736_v33 = vmul.f32 %v722_v31, %v2380_v8  ;;  %v740_v0 = vmul.f32 %v2388_v7, %v2384_v36  ;;  %v2574_v36 = vld [vmem:[#allocation27_spill] sm:$0xff]  ;;  %v2575_v31 = vld [vmem:[#allocation28_spill] sm:$0xff] }
 0x11e   :  { %1245 = vmatpush.bf16.msra.mxu0 %v2089_v47  ;;  %1273 = vmatpush.bf16.msra.mxu2 %v2101_v5  ;;  %v735_v47 = vmul.f32 %v723_v59, %v709_v3  ;;  %v739_v5 = vmul.f32 %v717_v50, %v713_v63  ;;  %v2583_v3 = vld [vmem:[#allocation36_spill] sm:$0xff] }
 0x11f   :  { %v2587_v63 = vld [vmem:[#allocation40_spill] sm:$0xff] }
 0x121   :  { %1259 = vmatpush.bf16.msra.mxu1 %v2091_v53  ;;  %1287 = vmatpush.bf16.msra.mxu3 %v2103_v6  ;;  %v737_v53 = vmul.f32 %v723_v59, %v711_v56  ;;  %v741_v6 = vmul.f32 %v717_v50, %v715_v27  ;;  %v2586_v56 = vld [vmem:[#allocation38_spill] sm:$0xff] }
 0x122   :  { %1246 = vmatpush.bf16.msra.mxu0 %v2110_v60  ;;  %1274 = vmatpush.bf16.msra.mxu2 %v2116_v14  ;;  %v2558_v60 = vld [vmem:[#allocation11_spill] sm:$0xff]  ;;  %v742_v14 = vadd.f32 %v738_v40, %v734_v57 }
 0x125   :  { %1260 = vmatpush.bf16.msra.mxu1 %v2114_v13  ;;  %1288 = vmatpush.bf16.msra.mxu3 %v2122_v61  ;;  %v2559_v13 = vld [vmem:[#allocation12_spill] sm:$0xff]  ;;  %v744_v61 = vadd.f32 %v740_v0, %v736_v33 }
 0x126   :  { %1247 = vmatpush.bf16.msra.mxu0 %v2124_v20  ;;  %1275 = vmatpush.bf16.msra.mxu2 %v2134_v30  ;;  %v2560_v20 = vld [vmem:[#allocation13_spill] sm:$0xff]  ;;  %v745_v30 = vadd.f32 %v741_v6, %v737_v53 }
 0x129   :  { %1196 = vmatmul.bf16.vlgmr.msrb.gmra.mxu0 %v732_v37  ;;  %1224 = vmatmul.bf16.vlgmr.msrb.gmra.mxu2 %v732_v37 }
 0x12a   :  { %1261 = vmatpush.bf16.msra.mxu1 %v2132_v26  ;;  %1289 = vmatpush.bf16.msra.mxu3 %v2140_v45  ;;  %v743_v26 = vadd.f32 %v739_v5, %v735_v47  ;;  %v2561_v45 = vld [vmem:[#allocation14_spill] sm:$0xff] }
 0x12b   :  { %1248 = vmatpush.bf16.msra.mxu0 %v2142_v46  ;;  %1276 = vmatpush.bf16.msra.mxu2 %v2149_v2  ;;  %v2562_v46 = vld [vmem:[#allocation17_spill] sm:$0xff]  ;;  %v2564_v2 = vld [vmem:[#allocation18_spill] sm:$0xff] }
 0x12c   :  { %1210 = vmatmul.bf16.vlgmr.msrb.gmra.mxu1 %v733_v12  ;;  %1238 = vmatmul.bf16.vlgmr.msrb.gmra.mxu3 %v733_v12 }
 0x12e   :  { %1262 = vmatpush.bf16.msra.mxu1 %v2144_v42  ;;  %1290 = vmatpush.bf16.msra.mxu3 %v2155_v41  ;;  %v2563_v42 = vld [vmem:[#allocation15_spill] sm:$0xff]  ;;  %v746_v41 = vpack.c.bf16 %v744_v61, %v742_v14 }
 0x12f   :  { %1249 = vmatpush.bf16.msra.mxu0 %v2157_v15  ;;  %1277 = vmatpush.bf16.msra.mxu2 %v2171_v22  ;;  %v1376_v15 = vld [vmem:[%s2487_s0 + $0x10] sm:$0xff]  ;;  %v2566_v22 = vld [vmem:[#allocation19_spill] sm:$0xff] }
 0x130   :  { %1772 = vtanh.f32 %v1376_v15 }
 0x132   :  { %1263 = vmatpush.bf16.msra.mxu1 %v2169_v1  ;;  %1291 = vmatpush.bf16.msra.mxu3 %v2177_v34  ;;  %v2565_v1 = vld [vmem:[#allocation16_spill] sm:$0xff]  ;;  %v747_v34 = vpack.c.bf16 %v745_v30, %v743_v26 }
 0x133   :  { %1250 = vmatpush.bf16.msra.mxu0 %v2179_v35  ;;  %1278 = vmatpush.bf16.msra.mxu2 %v2187_v52  ;;  %v1377_v35 = vld [vmem:[%s2487_s0 + $0x18] sm:$0xff]  ;;  %v2567_v52 = vld [vmem:[#allocation20_spill] sm:$0xff]  ;;  %s1869_s0 = smov [#allocation7]  }
 0x134   :  { %1774 = vtanh.f32 %v1377_v35  ;;  %s1404_s20 = sshll.u32 %s1869_s0, 4  ;;  %s1405_s20 = int_to_ptr.vmem [resolvable:$true] %s1404_s20 }
 0x136   :  { %1264 = vmatpush.bf16.msra.mxu1 %v2558_v60  ;;  %1292 = vmatpush.bf16.msra.mxu3 %v2559_v13  ;;  %v1773_v17 = vpop.eup %1772 }
 0x137   :  { %1251 = vmatpush.bf16.msra.mxu0 %v2560_v20  ;;  %1279 = vmatpush.bf16.msra.mxu2 %v2204_v38  ;;  %v2568_v38 = vld [vmem:[#allocation22_spill] sm:$0xff]  ;;  %v1380_v8 = vmul.f32 0.0625, %v1773_v17 }
 0x139   :  { %1384 = vperm.xlu1 %1767, %v1380_v8  }
 0x13a   :  { %1265 = vmatpush.bf16.msra.mxu1 %v2563_v42  ;;  %1293 = vmatpush.bf16.msra.mxu3 %v2564_v2  ;;  %v1775_v7 = vpop.eup %1774 }
 0x13b   :  { %1300 = vmatpush.bf16.msrb.mxu0 %v2561_v45  ;;  %1328 = vmatpush.bf16.msrb.mxu2 %v2562_v46  ;;  %v1381_v21 = vmul.f32 0.0625, %v1775_v7 }
 0x13c   :  { %1252 = vmatmul.bf16.vlgmr.msra.gmra.mxu0 %v746_v41  ;;  %1280 = vmatmul.bf16.vlgmr.msra.gmra.mxu2 %v746_v41 }
 0x13d   :  { %1266 = vmatmul.bf16.vlgmr.msra.gmra.mxu1 %v747_v34  ;;  %1294 = vmatmul.bf16.vlgmr.msra.gmra.mxu3 %v747_v34 }
 0x13e   :  { %1314 = vmatpush.bf16.msrb.mxu1 %v2565_v1  ;;  %1342 = vmatpush.bf16.msrb.mxu3 %v2566_v22 }
 0x13f   :  { %1301 = vmatpush.bf16.msrb.mxu0 %v2567_v52  ;;  %1329 = vmatpush.bf16.msrb.mxu2 %v2568_v38 }
 0x141   :  { %1389 = vperm.xlu1 %1767, %v1381_v21  }
 0x142   :  { %1315 = vmatpush.bf16.msrb.mxu1 %v2569_v43  ;;  %1343 = vmatpush.bf16.msrb.mxu3 %v2570_v58 }
 0x143   :  { %1302 = vmatpush.bf16.msrb.mxu0 %v2571_v54  ;;  %1330 = vmatpush.bf16.msrb.mxu2 %v2572_v4 }
 0x146   :  { %1316 = vmatpush.bf16.msrb.mxu1 %v2573_v18  ;;  %1344 = vmatpush.bf16.msrb.mxu3 %v2574_v36 }
 0x147   :  { %1303 = vmatpush.bf16.msrb.mxu0 %v2575_v31  ;;  %1331 = vmatpush.bf16.msrb.mxu2 %v2576_v24 }
 0x14a   :  { %1317 = vmatpush.bf16.msrb.mxu1 %v2577_v44  ;;  %1345 = vmatpush.bf16.msrb.mxu3 %v2578_v11 }
 0x14b   :  { %1304 = vmatpush.bf16.msrb.mxu0 %v2579_v16  ;;  %1332 = vmatpush.bf16.msrb.mxu2 %v2580_v32 }
 0x14e   :  { %1318 = vmatpush.bf16.msrb.mxu1 %v2581_v29  ;;  %1346 = vmatpush.bf16.msrb.mxu3 %v2582_v48 }
 0x14f   :  { %1305 = vmatpush.bf16.msrb.mxu0 %v2583_v3  ;;  %1333 = vmatpush.bf16.msrb.mxu2 %v2323_v51 }
 0x152   :  { %1319 = vmatpush.bf16.msrb.mxu1 %v2321_v49  ;;  %1347 = vmatpush.bf16.msrb.mxu3 %v2330_v10 }
 0x153   :  { %1306 = vmatpush.bf16.msrb.mxu0 %v2332_v23  ;;  %1334 = vmatpush.bf16.msrb.mxu2 %v2340_v55 }
 0x156   :  { %1320 = vmatpush.bf16.msrb.mxu1 %v2338_v62  ;;  %1348 = vmatpush.bf16.msrb.mxu3 %v2346_v19 }
 0x157   :  { %1307 = vmatpush.bf16.msrb.mxu0 %v2584_v9  ;;  %1335 = vmatpush.bf16.msrb.mxu2 %v2585_v28 }
 0x15a   :  { %1321 = vmatpush.bf16.msrb.mxu1 %v2586_v56  ;;  %1349 = vmatpush.bf16.msrb.mxu3 %v2587_v63 }
 0x15b   :  { %1308 = vmatmul.bf16.vlgmr.msrb.gmra.mxu0 %v746_v41  ;;  %1336 = vmatmul.bf16.vlgmr.msrb.gmra.mxu2 %v746_v41 }
 0x15d   :  { %1322 = vmatmul.bf16.vlgmr.msrb.gmra.mxu1 %v747_v34  ;;  %1350 = vmatmul.bf16.vlgmr.msrb.gmra.mxu3 %v747_v34 }
 0x196   :  { %v1141_v10 = vpop.f32.mrf.mxu0 }
 0x199   :  { %v1155_v23 = vpop.f32.mrf.mxu1 }
 0x19a   :  { %v1156_v30 = vadd.f32 %v1155_v23, %v1141_v10 }
 0x19c   :  { %v1169_v49 = vpop.f32.mrf.mxu2 }
 0x19e   :  { %v1143_v55 = vpop.f32.mrf.mxu0 }
 0x19f   :  { %v1183_v51 = vpop.f32.mrf.mxu3 }
 0x1a0   :  { %v1184_v35 = vadd.f32 %v1183_v51, %v1169_v49 }
 0x1a1   :  { %v1157_v62 = vpop.f32.mrf.mxu1 }
 0x1a2   :  { %v1158_v8 = vadd.f32 %v1157_v62, %v1143_v55 }
 0x1a4   :  { %v1171_v27 = vpop.f32.mrf.mxu2 }
 0x1a6   :  { %v1197_v50 = vpop.f32.mrf.mxu0 }
 0x1a7   :  { %v1185_v19 = vpop.f32.mrf.mxu3 }
 0x1a8   :  { %v1186_v28 = vadd.f32 %v1185_v19, %v1171_v27 }
 0x1a9   :  { %v1211_v59 = vpop.f32.mrf.mxu1 }
 0x1aa   :  { %v1212_v61 = vadd.f32 %v1211_v59, %v1197_v50 }
 0x1ab   :  { %v1385_v52 = vpop.permute.xlu1 %1384 }
 0x1ac   :  { %v1225_v37 = vpop.f32.mrf.mxu2 }
 0x1ae   :  { %v1199_v39 = vpop.f32.mrf.mxu0 }
 0x1af   :  { %v1239_v25 = vpop.f32.mrf.mxu3 }
 0x1b0   :  { %v1240_v41 = vadd.f32 %v1239_v25, %v1225_v37 }
 0x1b1   :  { %v1213_v12 = vpop.f32.mrf.mxu1 }
 0x1b2   :  { %v1214_v43 = vadd.f32 %v1213_v12, %v1199_v39 }
 0x1b3   :  { %v1390_v51 = vpop.permute.xlu1 %1389 }
 0x1b4   :  { %v1227_v57 = vpop.f32.mrf.mxu2 }
 0x1b7   :  { %v1241_v33 = vpop.f32.mrf.mxu3 }
 0x1b8   :  { %v1242_v32 = vadd.f32 %v1241_v33, %v1227_v57 }
 0x1b9   :  { %v1253_v40 = vpop.f32.mrf.mxu0 }
 0x1ba   :  { %v1267_v0 = vpop.f32.mrf.mxu1 }
 0x1bb   :  { %v1268_v60 = vadd.f32 %v1267_v0, %v1253_v40 }
 0x1bd   :  { %v1360_v45 = vadd.f32 %v1268_v60, %v1212_v61 }
 0x1bf   :  { %v1281_v47 = vpop.f32.mrf.mxu2  ;;  %v1368_v15 = vmul.f32 %v1360_v45, %v1360_v45 }
 0x1c0   :  { %v1295_v53 = vpop.f32.mrf.mxu3 }
 0x1c1   :  { %v1255_v5 = vpop.f32.mrf.mxu0  ;;  %v1296_v42 = vadd.f32 %v1295_v53, %v1281_v47 }
 0x1c2   :  { %v1269_v6 = vpop.f32.mrf.mxu1 }
 0x1c3   :  { %v1270_v1 = vadd.f32 %v1269_v6, %v1255_v5  ;;  %v1361_v58 = vadd.f32 %v1296_v42, %v1240_v41 }
 0x1c5   :  { %v1362_v36 = vadd.f32 %v1270_v1, %v1214_v43  ;;  %v1369_v44 = vmul.f32 %v1361_v58, %v1361_v58 }
 0x1c7   :  { %v1283_v13 = vpop.f32.mrf.mxu2  ;;  %v1370_v29 = vmul.f32 %v1362_v36, %v1362_v36 }
 0x1c8   :  { %v1297_v14 = vpop.f32.mrf.mxu3 }
 0x1c9   :  { %v1298_v11 = vadd.f32 %v1297_v14, %v1283_v13 }
 0x1cb   :  { %v1363_v63 = vadd.f32 %v1298_v11, %v1242_v32 }
 0x1cd   :  { %v1371_v50 = vmul.f32 %v1363_v63, %v1363_v63 }
 0x1d8   :  { %v1309_v20 = vpop.f32.mrf.mxu0 }
 0x1da   :  { %v1323_v26 = vpop.f32.mrf.mxu1 }
 0x1db   :  { %v1324_v46 = vadd.f32 %v1323_v26, %v1309_v20 }
 0x1dd   :  { %v1356_v2 = vsub.f32 %v1156_v30, %v1324_v46 }
 0x1de   :  { %v1337_v34 = vpop.f32.mrf.mxu2 }
 0x1df   :  { %v1364_v22 = vmul.f32 %v1356_v2, %v1356_v2 }
 0x1e0   :  { %v1351_v38 = vpop.f32.mrf.mxu3  ;;  %v1311_v4 = vpop.f32.mrf.mxu0 }
 0x1e1   :  { %v1372_v17 = vadd.f32 %v1368_v15, %v1364_v22  ;;  %v1352_v54 = vadd.f32 %v1351_v38, %v1337_v34 }
 0x1e2   :  { %v1325_v18 = vpop.f32.mrf.mxu1 }
 0x1e3   :  { %v1392_v7 = vmul.f32 %v1385_v52, %v1372_v17  ;;  %v1357_v31 = vsub.f32 %v1184_v35, %v1352_v54  ;;  %v1326_v24 = vadd.f32 %v1325_v18, %v1311_v4 }
 0x1e5   :  { %1396 = vst [vmem:[#allocation7] sm:$0xff] %v1392_v7  ;;  %v1365_v21 = vmul.f32 %v1357_v31, %v1357_v31  ;;  %v1358_v16 = vsub.f32 %v1158_v8, %v1326_v24 }
 0x1e6   :  { %v1339_v9 = vpop.f32.mrf.mxu2 }
 0x1e7   :  { %v1373_v48 = vadd.f32 %v1369_v44, %v1365_v21  ;;  %v1366_v3 = vmul.f32 %v1358_v16, %v1358_v16 }
 0x1e8   :  { %v1353_v56 = vpop.f32.mrf.mxu3 }
 0x1e9   :  { %v1393_v10 = vmul.f32 %v1385_v52, %v1373_v48  ;;  %v1374_v23 = vadd.f32 %v1370_v29, %v1366_v3  ;;  %v1354_v49 = vadd.f32 %v1353_v56, %v1339_v9 }
 0x1eb   :  { %1397 = vst [vmem:[#allocation7 + $0x8] sm:$0xff] %v1393_v10  ;;  %v1394_v55 = vmul.f32 %v1390_v51, %v1374_v23  ;;  %v1359_v62 = vsub.f32 %v1186_v28, %v1354_v49 }
 0x1ed   :  { %1398 = vst [vmem:[#allocation7 + $0x10] sm:$0xff] %v1394_v55  ;;  %v1367_v59 = vmul.f32 %v1359_v62, %v1359_v62 }
 0x1ef   :  { %v1375_v37 = vadd.f32 %v1371_v50, %v1367_v59 }
 0x1f1   :  { %v1395_v27 = vmul.f32 %v1390_v51, %v1375_v37 }
 0x1f3   :  { %1399 = vst [vmem:[#allocation7 + $0x18] sm:$0xff] %v1395_v27 }
 0x1f4   :  { %1412 = dma.vmem_to_hbm [thread:$0]  %s1405_s20, 512, %s1407_s23, [#allocation4], %s1860_s27, %s1860_s27, %s1861_s28  }
 0x1f5   :  { %1854 = dma.done.wait [#allocation4], 512  }
 0x1f6   :  { %1855 = vsyncadd [#allocation4], 4294966784 }
 0x1f7   :  { %1417 = vsyncpa [#allocation3], 1 }
 0x1f8   :  { %1418 = vsyncpa [#allocation6], 1 }
 0x1f9   :  { %1419 = vsyncpa [#allocation4], 1 }

</bundles_post_ra>
